<compile_context>
chip_gen: v6e
topology: v6e:2x2x1
jax: 0.10.0
libtpu: 0.0.40
codegen_flags: <defaults>
</compile_context>

<pallas_src>
import functools
import math

import jax
import jax.numpy as jnp
from jax.experimental import pallas as pl
from jax.experimental.pallas import tpu as pltpu


# ----------------------------------------------------------------------------
# In-kernel helpers
# ----------------------------------------------------------------------------
def _softmax_rows(s):
    """Row softmax in f32; denominator reciprocal goes to the EUP (approx)."""
    s = s - jnp.max(s, axis=-1, keepdims=True)
    p = jnp.exp(s)
    return p * pl.reciprocal(jnp.sum(p, axis=-1, keepdims=True), approx=True)


# ----------------------------------------------------------------------------
# Fused MemoryEncoder kernel (per batch element)
#   corr (VMEM only) -> cost tokens -> latent self-attn -> cost memory
#   + hoisted decoder K/V projections, context tokens and loop-invariant
#     query component qc = ctx_tok @ Wcq.
# ----------------------------------------------------------------------------
def encoder_kernel(f1_ref, f2_ref, ctx_ref,
                   tok_w_ref, tok_b_ref,
                   wq_ref, wk_ref, wv_ref, wo_ref,
                   ctx_w_ref, ctx_b_ref,
                   dwk_ref, dwv_ref, dwcq_ref,
                   kdec_ref, vdec_ref, ctxtok_ref, qc_ref):
    f32 = jnp.float32
    bf16 = jnp.bfloat16

    f1 = f1_ref[...]                          # [N, C] bf16
    f2 = f2_ref[...]                          # [N, C] bf16
    c_scale = 1.0 / math.sqrt(f1_ref.shape[-1])

    # Cost volume: contract the C axes directly (no transpose / relayout),
    # stays in VMEM only.
    corr = jax.lax.dot_general(
        f1, f2, (((1,), (1,)), ((), ())),
        preferred_element_type=f32) * c_scale                     # [N, N] f32

    # Cost tokenization (full-N contraction — token_w is (N, D) by design).
    tokens = (jnp.dot(corr.astype(bf16), tok_w_ref[...],
                      preferred_element_type=f32) + tok_b_ref[...])  # [N, D]

    # Latent self-attention with residual.
    t = tokens.astype(bf16)
    q = jnp.dot(t, wq_ref[...], preferred_element_type=f32)
    k = jnp.dot(t, wk_ref[...], preferred_element_type=f32)
    v = jnp.dot(t, wv_ref[...], preferred_element_type=f32)
    s = jax.lax.dot_general(
        q.astype(bf16), k.astype(bf16), (((1,), (1,)), ((), ())),
        preferred_element_type=f32) * (1.0 / math.sqrt(q.shape[-1]))
    p = _softmax_rows(s)
    a = jnp.dot(p.astype(bf16), v.astype(bf16), preferred_element_type=f32)
    mem = tokens + jnp.dot(a.astype(bf16), wo_ref[...],
                           preferred_element_type=f32)            # cost memory

    # Hoisted, loop-invariant decoder projections (K, V) in bf16.
    mem_bf = mem.astype(bf16)
    kdec_ref[...] = jnp.dot(mem_bf, dwk_ref[...],
                            preferred_element_type=f32).astype(bf16)
    vdec_ref[...] = jnp.dot(mem_bf, dwv_ref[...],
                            preferred_element_type=f32).astype(bf16)

    # Context tokens + loop-invariant query component.
    ctx = ctx_ref[...]                                            # [N, C] bf16
    ctx_tok = (jnp.dot(ctx, ctx_w_ref[...], preferred_element_type=f32)
               + ctx_b_ref[...])
    ctxtok_ref[...] = ctx_tok
    qc_ref[...] = jnp.dot(ctx_tok.astype(bf16), dwcq_ref[...],
                          preferred_element_type=f32)


# ----------------------------------------------------------------------------
# Fused MemoryDecoder kernel: all refinement iterations in one call.
#   q = qc + flow * Wfq (VPU broadcast FMAs, no K=2 matmul)
#   cross-attention against hoisted K/V, GELU MLP, packed flow|info heads.
#   Single lane-dense padded output [N, out_width].
# ----------------------------------------------------------------------------
def decoder_kernel(ctxtok_ref, qc_ref, k_ref, v_ref, flow0_ref,
                   wfq_ref, w1_ref, b1_ref, w2_ref, b2_ref,
                   out_ref, *, iters, out_width):
    f32 = jnp.float32
    bf16 = jnp.bfloat16

    ctx = ctxtok_ref[...]                     # [N, D] f32 (residual)
    qc = qc_ref[...]                          # [N, D] f32 (loop-invariant q)
    k = k_ref[...]                            # [N, D] bf16 (hoisted)
    v = v_ref[...]                            # [N, D] bf16 (hoisted)
    wfq = wfq_ref[...]                        # [2, D] f32 (VPU path)
    scale = 1.0 / math.sqrt(qc.shape[-1])

    flow = flow0_ref[...]                     # [N, 2] f32
    chunks = []
    for _ in range(iters):                    # static unroll, K/V stay in VMEM
        # Flow contribution to the query via two broadcast FMAs (VPU).
        q = qc + flow[:, 0:1] * wfq[0:1, :] + flow[:, 1:2] * wfq[1:2, :]
        s = jax.lax.dot_general(
            q.astype(bf16), k, (((1,), (1,)), ((), ())),
            preferred_element_type=f32) * scale
        p = _softmax_rows(s)
        a = jnp.dot(p.astype(bf16), v, preferred_element_type=f32)
        feat = a + ctx
        h = jax.nn.gelu(jnp.dot(feat.astype(bf16), w1_ref[...],
                                preferred_element_type=f32) + b1_ref[...])
        # Packed flow/info heads: one [Dh, 4] matmul instead of two [Dh, 2].
        heads = (jnp.dot(h.astype(bf16), w2_ref[...],
                         preferred_element_type=f32) + b2_ref[...])   # [N, 4]
        flow = flow + heads[:, 0:2]
        chunks.append(flow)                   # cumulative flow prediction
        chunks.append(heads[:, 2:4])          # info prediction

    packed = jnp.concatenate(chunks, axis=-1)               # [N, 4*iters]
    pad = out_width - 4 * iters
    if pad > 0:
        packed = jnp.concatenate(
            [packed, jnp.zeros((packed.shape[0], pad), f32)], axis=-1)
    out_ref[...] = packed                                    # one dense store


# ----------------------------------------------------------------------------
# pallas_call wrappers
# ----------------------------------------------------------------------------
def _wspec(shape):
    return pl.BlockSpec(shape, lambda b: (0, 0))


_COMPILER_PARAMS = pltpu.CompilerParams(
    dimension_semantics=("parallel",),
    vmem_limit_bytes=48 * 1024 * 1024,   # safe on v7x (64 MiB) and v5e/v6e
)


def memory_encoder(f1, f2, ctx, p):
    B, N, C = f1.shape
    D = p["enc_wq"].shape[0]
    feat_spec = pl.BlockSpec((None, N, C), lambda b: (b, 0, 0))
    tok_spec = pl.BlockSpec((None, N, D), lambda b: (b, 0, 0))
    kdec, vdec, ctx_tok, qc = pl.pallas_call(
        encoder_kernel,
        out_shape=(
            jax.ShapeDtypeStruct((B, N, D), jnp.bfloat16),   # decoder K
            jax.ShapeDtypeStruct((B, N, D), jnp.bfloat16),   # decoder V
            jax.ShapeDtypeStruct((B, N, D), jnp.float32),    # context tokens
            jax.ShapeDtypeStruct((B, N, D), jnp.float32),    # qc = ctx_tok@Wcq
        ),
        grid=(B,),
        in_specs=[
            feat_spec, feat_spec, feat_spec,
            _wspec((N, D)), _wspec((1, D)),
            _wspec((D, D)), _wspec((D, D)), _wspec((D, D)), _wspec((D, D)),
            _wspec((C, D)), _wspec((1, D)),
            _wspec((D, D)), _wspec((D, D)), _wspec((D, D)),
        ],
        out_specs=(tok_spec, tok_spec, tok_spec, tok_spec),
        compiler_params=_COMPILER_PARAMS,
    )(
        f1, f2, ctx,
        p["token_w"], p["token_b"],
        p["enc_wq"], p["enc_wk"], p["enc_wv"], p["enc_wo"],
        p["ctx_w"], p["ctx_b"],
        p["dec_wk"], p["dec_wv"], p["dec_wcq"],
    )
    return kdec, vdec, ctx_tok, qc


def memory_decoder(ctx_tok, qc, kdec, vdec, flow0, p, iters):
    B, N, D = ctx_tok.shape
    Dh = p["dec_w1"].shape[1]
    out_width = ((4 * iters + 127) // 128) * 128       # lane-dense padded out

    # Pack the two heads into one weight / bias (bf16 weights, f32 bias).
    w2 = jnp.concatenate([p["dec_w2f"], p["dec_w2i"]], axis=1)     # [Dh, 4]
    b2 = jnp.concatenate([p["dec_b2f"], p["dec_b2i"]], axis=1)     # [1, 4]

    kernel = functools.partial(decoder_kernel, iters=iters, out_width=out_width)
    tok_spec = pl.BlockSpec((None, N, D), lambda b: (b, 0, 0))
    out = pl.pallas_call(
        kernel,
        out_shape=jax.ShapeDtypeStruct((B, N, out_width), jnp.float32),
        grid=(B,),
        in_specs=[
            tok_spec, tok_spec, tok_spec, tok_spec,
            pl.BlockSpec((None, N, 2), lambda b: (b, 0, 0)),  # initial flow
            _wspec((2, D)),                                   # wfq (VPU)
            _wspec((D, Dh)), _wspec((1, Dh)),                 # MLP
            _wspec((Dh, 4)), _wspec((1, 4)),                  # packed heads
        ],
        out_specs=pl.BlockSpec((None, N, out_width), lambda b: (b, 0, 0)),
        compiler_params=_COMPILER_PARAMS,
    )(
        ctx_tok, qc, kdec, vdec, flow0,
        p["dec_wfq"], p["dec_w1"], p["dec_b1"], w2, b2,
    )
    return out


# ----------------------------------------------------------------------------
# Parameter init + full forward
# ----------------------------------------------------------------------------
def init_params(key, C, N, D, Dh):
    ks = jax.random.split(key, 13)

    def w(k, shape, fan_in):
        return (1.0 / math.sqrt(fan_in)) * jax.random.normal(k, shape, jnp.float32)

    return {
        # memory encoder
        "token_w": w(ks[0], (N, D), N),
        "token_b": jnp.zeros((1, D), jnp.float32),
        "enc_wq": w(ks[1], (D, D), D),
        "enc_wk": w(ks[2], (D, D), D),
        "enc_wv": w(ks[3], (D, D), D),
        "enc_wo": w(ks[4], (D, D), D),
        # context projection
        "ctx_w": w(ks[5], (C, D), C),
        "ctx_b": jnp.zeros((1, D), jnp.float32),
        # memory decoder
        "dec_wcq": w(ks[6], (D, D), D),
        "dec_wfq": w(ks[7], (2, D), 2),
        "dec_wk": w(ks[8], (D, D), D),
        "dec_wv": w(ks[9], (D, D), D),
        "dec_w1": w(ks[10], (D, Dh), D),
        "dec_b1": jnp.zeros((1, Dh), jnp.float32),
        "dec_w2f": w(ks[11], (Dh, 2), Dh),
        "dec_b2f": jnp.zeros((1, 2), jnp.float32),
        "dec_w2i": w(ks[12], (Dh, 2), Dh),
        "dec_b2i": jnp.zeros((1, 2), jnp.float32),
    }


_BF16_WEIGHTS = (
    "token_w", "enc_wq", "enc_wk", "enc_wv", "enc_wo", "ctx_w",
    "dec_wk", "dec_wv", "dec_wcq", "dec_w1", "dec_w2f", "dec_w2i",
)


def _cast_params(params):
    """MXU-side weights in bf16 (f32 accumulation in-kernel); biases and the
    VPU-path wfq stay f32."""
    p = dict(params)
    for name in _BF16_WEIGHTS:
        p[name] = params[name].astype(jnp.bfloat16)
    return p


def flowformer_forward(params, feature1, feature2, context, flow_init=None,
                       iters=3):
    B, H, W, C = feature1.shape
    N = H * W
    p = _cast_params(params)

    f1 = feature1.reshape(B, N, C).astype(jnp.bfloat16)
    f2 = feature2.reshape(B, N, C).astype(jnp.bfloat16)
    ctx = context.reshape(B, N, C).astype(jnp.bfloat16)

    # ---- MemoryEncoder (single fused pallas_call) ----
    kdec, vdec, ctx_tok, qc = memory_encoder(f1, f2, ctx, p)

    # ---- MemoryDecoder (single fused pallas_call, all iterations) ----
    if flow_init is None:
        flow0 = jnp.zeros((B, N, 2), jnp.float32)
    else:  # flow_init given NCHW, like PyTorch
        flow0 = flow_init.transpose(0, 2, 3, 1).reshape(B, N, 2).astype(jnp.float32)

    packed = memory_decoder(ctx_tok, qc, kdec, vdec, flow0, p, iters)

    flow_predictions = []
    info_predictions = []
    for it in range(iters):
        fl = packed[:, :, it * 4: it * 4 + 2]
        nf = packed[:, :, it * 4 + 2: it * 4 + 4]
        flow_predictions.append(
            fl.reshape(B, H, W, 2).transpose(0, 3, 1, 2))     # NCHW [B,2,H,W]
        info_predictions.append(
            nf.reshape(B, H, W, 2).transpose(0, 3, 1, 2))     # NCHW [B,2,H,W]

    return {"flow_predictions": flow_predictions,
            "info_predictions": info_predictions}


# ----------------------------------------------------------------------------
if __name__ == "__main__":
    B, H, W, C = 2, 8, 8, 32
    N, D, Dh = H * W, 128, 128   # D/Dh multiples of 128 -> lane-dense matmuls

    key = jax.random.PRNGKey(0)
    k_f1, k_f2, k_ctx, k_par = jax.random.split(key, 4)
    feature1 = jax.random.normal(k_f1, (B, H, W, C), jnp.float32)
    feature2 = jax.random.normal(k_f2, (B, H, W, C), jnp.float32)
    context = jax.random.normal(k_ctx, (B, H, W, C), jnp.float32)

    params = init_params(k_par, C=C, N=N, D=D, Dh=Dh)

    out = flowformer_forward(params, feature1, feature2, context, flow_init=None)
    jax.block_until_ready(out["flow_predictions"])
    jax.block_until_ready(out["info_predictions"])

    assert len(out["flow_predictions"]) == 3
    assert out["flow_predictions"][0].shape == (B, 2, H, W)
    assert out["info_predictions"][0].shape == (B, 2, H, W)
    print("KERNEL_OK")
</pallas_src>

<mosaic_0001>
module attributes {stable_mosaic.version = 11 : i64} {
  func.func @encoder_kernel(%arg0: i32, %arg1: memref<1x64x32xbf16, #tpu.memory_space<vmem>>, %arg2: memref<1x64x32xbf16, #tpu.memory_space<vmem>>, %arg3: memref<1x64x32xbf16, #tpu.memory_space<vmem>>, %arg4: memref<64x128xbf16, #tpu.memory_space<vmem>>, %arg5: memref<1x128xf32, #tpu.memory_space<vmem>>, %arg6: memref<128x128xbf16, #tpu.memory_space<vmem>>, %arg7: memref<128x128xbf16, #tpu.memory_space<vmem>>, %arg8: memref<128x128xbf16, #tpu.memory_space<vmem>>, %arg9: memref<128x128xbf16, #tpu.memory_space<vmem>>, %arg10: memref<32x128xbf16, #tpu.memory_space<vmem>>, %arg11: memref<1x128xf32, #tpu.memory_space<vmem>>, %arg12: memref<128x128xbf16, #tpu.memory_space<vmem>>, %arg13: memref<128x128xbf16, #tpu.memory_space<vmem>>, %arg14: memref<128x128xbf16, #tpu.memory_space<vmem>>, %arg15: memref<1x64x128xbf16, #tpu.memory_space<vmem>>, %arg16: memref<1x64x128xbf16, #tpu.memory_space<vmem>>, %arg17: memref<1x64x128xf32, #tpu.memory_space<vmem>>, %arg18: memref<1x64x128xf32, #tpu.memory_space<vmem>>) attributes {dimension_semantics = [#tpu.dimension_semantics<parallel>], iteration_bounds = array<i64: 2>, scalar_prefetch = 0 : i64, scratch_operands = 0 : i64, tpu.core_type = #tpu.core_type<tc>, window_params = [{transform_indices = @transform_0, window_bounds = array<i64: 1, 64, 32>}, {transform_indices = @transform_1, window_bounds = array<i64: 1, 64, 32>}, {transform_indices = @transform_2, window_bounds = array<i64: 1, 64, 32>}, {pipeline_mode = #tpu.pipeline_mode<synchronous>, transform_indices = @transform_3, window_bounds = array<i64: 64, 128>}, {pipeline_mode = #tpu.pipeline_mode<synchronous>, transform_indices = @transform_4, window_bounds = array<i64: 1, 128>}, {pipeline_mode = #tpu.pipeline_mode<synchronous>, transform_indices = @transform_5, window_bounds = array<i64: 128, 128>}, {pipeline_mode = #tpu.pipeline_mode<synchronous>, transform_indices = @transform_6, window_bounds = array<i64: 128, 128>}, {pipeline_mode = #tpu.pipeline_mode<synchronous>, transform_indices = @transform_7, window_bounds = array<i64: 128, 128>}, {pipeline_mode = #tpu.pipeline_mode<synchronous>, transform_indices = @transform_8, window_bounds = array<i64: 128, 128>}, {pipeline_mode = #tpu.pipeline_mode<synchronous>, transform_indices = @transform_9, window_bounds = array<i64: 32, 128>}, {pipeline_mode = #tpu.pipeline_mode<synchronous>, transform_indices = @transform_10, window_bounds = array<i64: 1, 128>}, {pipeline_mode = #tpu.pipeline_mode<synchronous>, transform_indices = @transform_11, window_bounds = array<i64: 128, 128>}, {pipeline_mode = #tpu.pipeline_mode<synchronous>, transform_indices = @transform_12, window_bounds = array<i64: 128, 128>}, {pipeline_mode = #tpu.pipeline_mode<synchronous>, transform_indices = @transform_13, window_bounds = array<i64: 128, 128>}, {transform_indices = @transform_14, window_bounds = array<i64: 1, 64, 128>}, {transform_indices = @transform_15, window_bounds = array<i64: 1, 64, 128>}, {transform_indices = @transform_16, window_bounds = array<i64: 1, 64, 128>}, {transform_indices = @transform_17, window_bounds = array<i64: 1, 64, 128>}]} {
    %c0 = arith.constant 0 : index
    %c0_0 = arith.constant 0 : index
    %c0_1 = arith.constant 0 : index
    %0 = vector.load %arg1[%c0, %c0_0, %c0_1] : memref<1x64x32xbf16, #tpu.memory_space<vmem>>, vector<1x64x32xbf16>
    %1 = vector.shape_cast %0 : vector<1x64x32xbf16> to vector<64x32xbf16>
    %c0_2 = arith.constant 0 : index
    %c0_3 = arith.constant 0 : index
    %c0_4 = arith.constant 0 : index
    %2 = vector.load %arg2[%c0_2, %c0_3, %c0_4] : memref<1x64x32xbf16, #tpu.memory_space<vmem>>, vector<1x64x32xbf16>
    %3 = vector.shape_cast %2 : vector<1x64x32xbf16> to vector<64x32xbf16>
    %cst = arith.constant dense<0.000000e+00> : vector<64x64xf32>
    %4 = tpu.matmul %1, %3, %cst {dimension_numbers = #tpu.dot_dimension_numbers<[1], [1], [0], [0], [0, 0, 1, 0], [], []>} : vector<64x32xbf16>, vector<64x32xbf16>, vector<64x64xf32> -> vector<64x64xf32>
    %cst_5 = arith.constant 0.176776692 : f32
    %5 = vector.broadcast %cst_5 : f32 to vector<64x64xf32>
    %6 = arith.mulf %4, %5 : vector<64x64xf32>
    %7 = arith.truncf %6 : vector<64x64xf32> to vector<64x64xbf16>
    %c0_6 = arith.constant 0 : index
    %c0_7 = arith.constant 0 : index
    %8 = vector.load %arg4[%c0_6, %c0_7] : memref<64x128xbf16, #tpu.memory_space<vmem>>, vector<64x128xbf16>
    %cst_8 = arith.constant dense<0.000000e+00> : vector<64x128xf32>
    %9 = tpu.matmul %7, %8, %cst_8 {dimension_numbers = #tpu.dot_dimension_numbers<[1], [0], [0], [1], [0, 0, 1, 1], [], []>} : vector<64x64xbf16>, vector<64x128xbf16>, vector<64x128xf32> -> vector<64x128xf32>
    %c0_9 = arith.constant 0 : index
    %c0_10 = arith.constant 0 : index
    %10 = vector.load %arg5[%c0_9, %c0_10] : memref<1x128xf32, #tpu.memory_space<vmem>>, vector<1x128xf32>
    %11 = vector.broadcast %10 : vector<1x128xf32> to vector<64x128xf32>
    %12 = arith.addf %9, %11 : vector<64x128xf32>
    %13 = arith.truncf %12 : vector<64x128xf32> to vector<64x128xbf16>
    %c0_11 = arith.constant 0 : index
    %c0_12 = arith.constant 0 : index
    %14 = vector.load %arg6[%c0_11, %c0_12] : memref<128x128xbf16, #tpu.memory_space<vmem>>, vector<128x128xbf16>
    %cst_13 = arith.constant dense<0.000000e+00> : vector<64x128xf32>
    %15 = tpu.matmul %13, %14, %cst_13 {dimension_numbers = #tpu.dot_dimension_numbers<[1], [0], [0], [1], [0, 0, 1, 1], [], []>} : vector<64x128xbf16>, vector<128x128xbf16>, vector<64x128xf32> -> vector<64x128xf32>
    %c0_14 = arith.constant 0 : index
    %c0_15 = arith.constant 0 : index
    %16 = vector.load %arg7[%c0_14, %c0_15] : memref<128x128xbf16, #tpu.memory_space<vmem>>, vector<128x128xbf16>
    %cst_16 = arith.constant dense<0.000000e+00> : vector<64x128xf32>
    %17 = tpu.matmul %13, %16, %cst_16 {dimension_numbers = #tpu.dot_dimension_numbers<[1], [0], [0], [1], [0, 0, 1, 1], [], []>} : vector<64x128xbf16>, vector<128x128xbf16>, vector<64x128xf32> -> vector<64x128xf32>
    %c0_17 = arith.constant 0 : index
    %c0_18 = arith.constant 0 : index
    %18 = vector.load %arg8[%c0_17, %c0_18] : memref<128x128xbf16, #tpu.memory_space<vmem>>, vector<128x128xbf16>
    %cst_19 = arith.constant dense<0.000000e+00> : vector<64x128xf32>
    %19 = tpu.matmul %13, %18, %cst_19 {dimension_numbers = #tpu.dot_dimension_numbers<[1], [0], [0], [1], [0, 0, 1, 1], [], []>} : vector<64x128xbf16>, vector<128x128xbf16>, vector<64x128xf32> -> vector<64x128xf32>
    %20 = arith.truncf %15 : vector<64x128xf32> to vector<64x128xbf16>
    %21 = arith.truncf %17 : vector<64x128xf32> to vector<64x128xbf16>
    %cst_20 = arith.constant dense<0.000000e+00> : vector<64x64xf32>
    %22 = tpu.matmul %20, %21, %cst_20 {dimension_numbers = #tpu.dot_dimension_numbers<[1], [1], [0], [0], [0, 0, 1, 0], [], []>} : vector<64x128xbf16>, vector<64x128xbf16>, vector<64x64xf32> -> vector<64x64xf32>
    %cst_21 = arith.constant 0.0883883461 : f32
    %23 = vector.broadcast %cst_21 : f32 to vector<64x64xf32>
    %24 = arith.mulf %22, %23 : vector<64x64xf32>
    %cst_22 = arith.constant dense<0xFF800000> : vector<64xf32>
    %25 = vector.multi_reduction <maximumf>, %24, %cst_22 [1] : vector<64x64xf32> to vector<64xf32>
    %26 = vector.shape_cast %25 : vector<64xf32> to vector<64x1xf32>
    %27 = vector.broadcast %26 : vector<64x1xf32> to vector<64x64xf32>
    %28 = arith.subf %24, %27 : vector<64x64xf32>
    %29 = math.exp %28 : vector<64x64xf32>
    %cst_23 = arith.constant dense<0.000000e+00> : vector<64xf32>
    %30 = vector.multi_reduction <add>, %29, %cst_23 [1] : vector<64x64xf32> to vector<64xf32>
    %31 = vector.shape_cast %30 : vector<64xf32> to vector<64x1xf32>
    %32 = tpu.reciprocal %31 {approx = true} : vector<64x1xf32> -> vector<64x1xf32>
    %33 = vector.broadcast %32 : vector<64x1xf32> to vector<64x64xf32>
    %34 = arith.mulf %29, %33 : vector<64x64xf32>
    %35 = arith.truncf %34 : vector<64x64xf32> to vector<64x64xbf16>
    %36 = arith.truncf %19 : vector<64x128xf32> to vector<64x128xbf16>
    %cst_24 = arith.constant dense<0.000000e+00> : vector<64x128xf32>
    %37 = tpu.matmul %35, %36, %cst_24 {dimension_numbers = #tpu.dot_dimension_numbers<[1], [0], [0], [1], [0, 0, 1, 1], [], []>} : vector<64x64xbf16>, vector<64x128xbf16>, vector<64x128xf32> -> vector<64x128xf32>
    %38 = arith.truncf %37 : vector<64x128xf32> to vector<64x128xbf16>
    %c0_25 = arith.constant 0 : index
    %c0_26 = arith.constant 0 : index
    %39 = vector.load %arg9[%c0_25, %c0_26] : memref<128x128xbf16, #tpu.memory_space<vmem>>, vector<128x128xbf16>
    %cst_27 = arith.constant dense<0.000000e+00> : vector<64x128xf32>
    %40 = tpu.matmul %38, %39, %cst_27 {dimension_numbers = #tpu.dot_dimension_numbers<[1], [0], [0], [1], [0, 0, 1, 1], [], []>} : vector<64x128xbf16>, vector<128x128xbf16>, vector<64x128xf32> -> vector<64x128xf32>
    %41 = arith.addf %12, %40 : vector<64x128xf32>
    %42 = arith.truncf %41 : vector<64x128xf32> to vector<64x128xbf16>
    %c0_28 = arith.constant 0 : index
    %c0_29 = arith.constant 0 : index
    %43 = vector.load %arg12[%c0_28, %c0_29] : memref<128x128xbf16, #tpu.memory_space<vmem>>, vector<128x128xbf16>
    %cst_30 = arith.constant dense<0.000000e+00> : vector<64x128xf32>
    %44 = tpu.matmul %42, %43, %cst_30 {dimension_numbers = #tpu.dot_dimension_numbers<[1], [0], [0], [1], [0, 0, 1, 1], [], []>} : vector<64x128xbf16>, vector<128x128xbf16>, vector<64x128xf32> -> vector<64x128xf32>
    %45 = arith.truncf %44 : vector<64x128xf32> to vector<64x128xbf16>
    %c0_31 = arith.constant 0 : index
    %c0_32 = arith.constant 0 : index
    %c0_33 = arith.constant 0 : index
    %46 = vector.load %arg15[%c0_31, %c0_32, %c0_33] : memref<1x64x128xbf16, #tpu.memory_space<vmem>>, vector<1x64x128xbf16>
    %47 = vector.shape_cast %46 : vector<1x64x128xbf16> to vector<64x128xbf16>
    %48 = vector.shape_cast %45 : vector<64x128xbf16> to vector<1x64x128xbf16>
    tpu.vector_store %arg15[%c0_31, %c0_32, %c0_33], %48 {strides = array<i32>} : memref<1x64x128xbf16, #tpu.memory_space<vmem>>, vector<1x64x128xbf16>,
    %c0_34 = arith.constant 0 : index
    %c0_35 = arith.constant 0 : index
    %49 = vector.load %arg13[%c0_34, %c0_35] : memref<128x128xbf16, #tpu.memory_space<vmem>>, vector<128x128xbf16>
    %cst_36 = arith.constant dense<0.000000e+00> : vector<64x128xf32>
    %50 = tpu.matmul %42, %49, %cst_36 {dimension_numbers = #tpu.dot_dimension_numbers<[1], [0], [0], [1], [0, 0, 1, 1], [], []>} : vector<64x128xbf16>, vector<128x128xbf16>, vector<64x128xf32> -> vector<64x128xf32>
    %51 = arith.truncf %50 : vector<64x128xf32> to vector<64x128xbf16>
    %c0_37 = arith.constant 0 : index
    %c0_38 = arith.constant 0 : index
    %c0_39 = arith.constant 0 : index
    %52 = vector.load %arg16[%c0_37, %c0_38, %c0_39] : memref<1x64x128xbf16, #tpu.memory_space<vmem>>, vector<1x64x128xbf16>
    %53 = vector.shape_cast %52 : vector<1x64x128xbf16> to vector<64x128xbf16>
    %54 = vector.shape_cast %51 : vector<64x128xbf16> to vector<1x64x128xbf16>
    tpu.vector_store %arg16[%c0_37, %c0_38, %c0_39], %54 {strides = array<i32>} : memref<1x64x128xbf16, #tpu.memory_space<vmem>>, vector<1x64x128xbf16>,
    %c0_40 = arith.constant 0 : index
    %c0_41 = arith.constant 0 : index
    %c0_42 = arith.constant 0 : index
    %55 = vector.load %arg3[%c0_40, %c0_41, %c0_42] : memref<1x64x32xbf16, #tpu.memory_space<vmem>>, vector<1x64x32xbf16>
    %56 = vector.shape_cast %55 : vector<1x64x32xbf16> to vector<64x32xbf16>
    %c0_43 = arith.constant 0 : index
    %c0_44 = arith.constant 0 : index
    %57 = vector.load %arg10[%c0_43, %c0_44] : memref<32x128xbf16, #tpu.memory_space<vmem>>, vector<32x128xbf16>
    %cst_45 = arith.constant dense<0.000000e+00> : vector<64x128xf32>
    %58 = tpu.matmul %56, %57, %cst_45 {dimension_numbers = #tpu.dot_dimension_numbers<[1], [0], [0], [1], [0, 0, 1, 1], [], []>} : vector<64x32xbf16>, vector<32x128xbf16>, vector<64x128xf32> -> vector<64x128xf32>
    %c0_46 = arith.constant 0 : index
    %c0_47 = arith.constant 0 : index
    %59 = vector.load %arg11[%c0_46, %c0_47] : memref<1x128xf32, #tpu.memory_space<vmem>>, vector<1x128xf32>
    %60 = vector.broadcast %59 : vector<1x128xf32> to vector<64x128xf32>
    %61 = arith.addf %58, %60 : vector<64x128xf32>
    %c0_48 = arith.constant 0 : index
    %c0_49 = arith.constant 0 : index
    %c0_50 = arith.constant 0 : index
    %62 = vector.load %arg17[%c0_48, %c0_49, %c0_50] : memref<1x64x128xf32, #tpu.memory_space<vmem>>, vector<1x64x128xf32>
    %63 = vector.shape_cast %62 : vector<1x64x128xf32> to vector<64x128xf32>
    %64 = vector.shape_cast %61 : vector<64x128xf32> to vector<1x64x128xf32>
    tpu.vector_store %arg17[%c0_48, %c0_49, %c0_50], %64 {strides = array<i32>} : memref<1x64x128xf32, #tpu.memory_space<vmem>>, vector<1x64x128xf32>,
    %65 = arith.truncf %61 : vector<64x128xf32> to vector<64x128xbf16>
    %c0_51 = arith.constant 0 : index
    %c0_52 = arith.constant 0 : index
    %66 = vector.load %arg14[%c0_51, %c0_52] : memref<128x128xbf16, #tpu.memory_space<vmem>>, vector<128x128xbf16>
    %cst_53 = arith.constant dense<0.000000e+00> : vector<64x128xf32>
    %67 = tpu.matmul %65, %66, %cst_53 {dimension_numbers = #tpu.dot_dimension_numbers<[1], [0], [0], [1], [0, 0, 1, 1], [], []>} : vector<64x128xbf16>, vector<128x128xbf16>, vector<64x128xf32> -> vector<64x128xf32>
    %c0_54 = arith.constant 0 : index
    %c0_55 = arith.constant 0 : index
    %c0_56 = arith.constant 0 : index
    %68 = vector.load %arg18[%c0_54, %c0_55, %c0_56] : memref<1x64x128xf32, #tpu.memory_space<vmem>>, vector<1x64x128xf32>
    %69 = vector.shape_cast %68 : vector<1x64x128xf32> to vector<64x128xf32>
    %70 = vector.shape_cast %67 : vector<64x128xf32> to vector<1x64x128xf32>
    tpu.vector_store %arg18[%c0_54, %c0_55, %c0_56], %70 {strides = array<i32>} : memref<1x64x128xf32, #tpu.memory_space<vmem>>, vector<1x64x128xf32>,
    return
  }
  func.func @transform_0(%arg0: i32) -> (i32, i32, i32) {
    %c0_i32 = arith.constant 0 : i32
    %c0_i32_0 = arith.constant 0 : i32
    %c0_i32_1 = arith.constant 0 : i32
    return %arg0, %c0_i32, %c0_i32_0 : i32, i32, i32
  }
  func.func @transform_1(%arg0: i32) -> (i32, i32, i32) {
    %c0_i32 = arith.constant 0 : i32
    %c0_i32_0 = arith.constant 0 : i32
    %c0_i32_1 = arith.constant 0 : i32
    return %arg0, %c0_i32, %c0_i32_0 : i32, i32, i32
  }
  func.func @transform_2(%arg0: i32) -> (i32, i32, i32) {
    %c0_i32 = arith.constant 0 : i32
    %c0_i32_0 = arith.constant 0 : i32
    %c0_i32_1 = arith.constant 0 : i32
    return %arg0, %c0_i32, %c0_i32_0 : i32, i32, i32
  }
  func.func @transform_3(%arg0: i32) -> (i32, i32) {
    %c0_i32 = arith.constant 0 : i32
    %c0_i32_0 = arith.constant 0 : i32
    %c0_i32_1 = arith.constant 0 : i32
    return %c0_i32, %c0_i32_0 : i32, i32
  }
  func.func @transform_4(%arg0: i32) -> (i32, i32) {
    %c0_i32 = arith.constant 0 : i32
    %c0_i32_0 = arith.constant 0 : i32
    %c0_i32_1 = arith.constant 0 : i32
    return %c0_i32, %c0_i32_0 : i32, i32
  }
  func.func @transform_5(%arg0: i32) -> (i32, i32) {
    %c0_i32 = arith.constant 0 : i32
    %c0_i32_0 = arith.constant 0 : i32
    %c0_i32_1 = arith.constant 0 : i32
    return %c0_i32, %c0_i32_0 : i32, i32
  }
  func.func @transform_6(%arg0: i32) -> (i32, i32) {
    %c0_i32 = arith.constant 0 : i32
    %c0_i32_0 = arith.constant 0 : i32
    %c0_i32_1 = arith.constant 0 : i32
    return %c0_i32, %c0_i32_0 : i32, i32
  }
  func.func @transform_7(%arg0: i32) -> (i32, i32) {
    %c0_i32 = arith.constant 0 : i32
    %c0_i32_0 = arith.constant 0 : i32
    %c0_i32_1 = arith.constant 0 : i32
    return %c0_i32, %c0_i32_0 : i32, i32
  }
  func.func @transform_8(%arg0: i32) -> (i32, i32) {
    %c0_i32 = arith.constant 0 : i32
    %c0_i32_0 = arith.constant 0 : i32
    %c0_i32_1 = arith.constant 0 : i32
    return %c0_i32, %c0_i32_0 : i32, i32
  }
  func.func @transform_9(%arg0: i32) -> (i32, i32) {
    %c0_i32 = arith.constant 0 : i32
    %c0_i32_0 = arith.constant 0 : i32
    %c0_i32_1 = arith.constant 0 : i32
    return %c0_i32, %c0_i32_0 : i32, i32
  }
  func.func @transform_10(%arg0: i32) -> (i32, i32) {
    %c0_i32 = arith.constant 0 : i32
    %c0_i32_0 = arith.constant 0 : i32
    %c0_i32_1 = arith.constant 0 : i32
    return %c0_i32, %c0_i32_0 : i32, i32
  }
  func.func @transform_11(%arg0: i32) -> (i32, i32) {
    %c0_i32 = arith.constant 0 : i32
    %c0_i32_0 = arith.constant 0 : i32
    %c0_i32_1 = arith.constant 0 : i32
    return %c0_i32, %c0_i32_0 : i32, i32
  }
  func.func @transform_12(%arg0: i32) -> (i32, i32) {
    %c0_i32 = arith.constant 0 : i32
    %c0_i32_0 = arith.constant 0 : i32
    %c0_i32_1 = arith.constant 0 : i32
    return %c0_i32, %c0_i32_0 : i32, i32
  }
  func.func @transform_13(%arg0: i32) -> (i32, i32) {
    %c0_i32 = arith.constant 0 : i32
    %c0_i32_0 = arith.constant 0 : i32
    %c0_i32_1 = arith.constant 0 : i32
    return %c0_i32, %c0_i32_0 : i32, i32
  }
  func.func @transform_14(%arg0: i32) -> (i32, i32, i32) {
    %c0_i32 = arith.constant 0 : i32
    %c0_i32_0 = arith.constant 0 : i32
    %c0_i32_1 = arith.constant 0 : i32
    return %arg0, %c0_i32, %c0_i32_0 : i32, i32, i32
  }
  func.func @transform_15(%arg0: i32) -> (i32, i32, i32) {
    %c0_i32 = arith.constant 0 : i32
    %c0_i32_0 = arith.constant 0 : i32
    %c0_i32_1 = arith.constant 0 : i32
    return %arg0, %c0_i32, %c0_i32_0 : i32, i32, i32
  }
  func.func @transform_16(%arg0: i32) -> (i32, i32, i32) {
    %c0_i32 = arith.constant 0 : i32
    %c0_i32_0 = arith.constant 0 : i32
    %c0_i32_1 = arith.constant 0 : i32
    return %arg0, %c0_i32, %c0_i32_0 : i32, i32, i32
  }
  func.func @transform_17(%arg0: i32) -> (i32, i32, i32) {
    %c0_i32 = arith.constant 0 : i32
    %c0_i32_0 = arith.constant 0 : i32
    %c0_i32_1 = arith.constant 0 : i32
    return %arg0, %c0_i32, %c0_i32_0 : i32, i32, i32
  }
}

</mosaic_0001>

<bundles_post_ra>
// kernel: tpu_custom_call.1
= control target key start
LH: loop header
LB: loop body
LE: loop exit
PB: predicated region body
PF: predicated region fallthrough
CT: control target
= control target key end

     0   :  { %s4343_s0 = inlined_call_operand.vmem [shape: bf16[2,64,32], index: 0, kind: input, shape index: {}]   ;;  %s4344_s1 = inlined_call_operand.vmem [shape: bf16[2,64,32], index: 1, kind: input, shape index: {}]   ;;  %s4345_s2 = inlined_call_operand.vmem [shape: bf16[2,64,32], index: 2, kind: input, shape index: {}]   ;;  %s4346_s3 = inlined_call_operand.vmem [shape: bf16[64,128], index: 3, kind: input, shape index: {}]   ;;  %s4347_s4 = inlined_call_operand.vmem [shape: f32[1,128], index: 4, kind: input, shape index: {}]   ;;  %s4348_s5 = inlined_call_operand.vmem [shape: bf16[128,128], index: 5, kind: input, shape index: {}]   ;;  %s4349_s6 = inlined_call_operand.vmem [shape: bf16[128,128], index: 6, kind: input, shape index: {}]   ;;  %s4350_s7 = inlined_call_operand.vmem [shape: bf16[128,128], index: 7, kind: input, shape index: {}]   ;;  %s4351_s8 = inlined_call_operand.vmem [shape: bf16[128,128], index: 8, kind: input, shape index: {}]   ;;  %s4352_s9 = inlined_call_operand.hbm [shape: bf16[32,128], index: 9, kind: input, shape index: {}]   ;;  %s4353_s10 = inlined_call_operand.vmem [shape: f32[1,128], index: 10, kind: input, shape index: {}]   ;;  %s4354_s11 = inlined_call_operand.hbm [shape: bf16[128,128], index: 11, kind: input, shape index: {}]   ;;  %s4355_s12 = inlined_call_operand.hbm [shape: bf16[128,128], index: 12, kind: input, shape index: {}]   ;;  %s4356_s13 = inlined_call_operand.hbm [shape: bf16[128,128], index: 13, kind: input, shape index: {}]   ;;  %s4357_s14 = inlined_call_operand.hbm [shape: bf16[2,64,128], index: 14, kind: output, shape index: {0}]   ;;  %s4358_s15 = inlined_call_operand.hbm [shape: bf16[2,64,128], index: 15, kind: output, shape index: {1}]   ;;  %s4359_s16 = inlined_call_operand.hbm [shape: f32[2,64,128], index: 16, kind: output, shape index: {2}]   ;;  %s4360_s17 = inlined_call_operand.hbm [shape: f32[2,64,128], index: 17, kind: output, shape index: {3}]  }
   0x1   :  { %4371 = sst [smem:[#allocation28_spill]] %s4343_s0 }
   0x2   :  { %4372 = sst [smem:[#allocation29_spill]] %s4344_s1 }
   0x3   :  { %4373 = sst [smem:[#allocation30_spill]] %s4345_s2 }
   0x4   :  { %4374 = sst [smem:[#allocation31_spill]] %s4346_s3 }
   0x5   :  { %4375 = sst [smem:[#allocation32_spill]] %s4347_s4 }
   0x6   :  { %4376 = sst [smem:[#allocation33_spill]] %s4348_s5 }
   0x7   :  { %4377 = sst [smem:[#allocation34_spill]] %s4349_s6 }
   0x8   :  { %4378 = sst [smem:[#allocation35_spill]] %s4350_s7 }
   0x9   :  { %23 = vsyncpa [#allocation3], 0 }
   0xa   :  { %24 = vsyncpa [#allocation6], 0 }
   0xb   :  { %25 = vsyncpa [#allocation9], 0 }
   0xc   :  { %26 = vsyncpa [#allocation4], 0 }
   0xd   :  { %28 = vsyncpa [#allocation4 + $0x1], 0 }
   0xe   :  { %29 = vsyncpa [#allocation12], 0 }
   0xf   :  { %31 = vsyncpa [#allocation12 + $0x1], 0 }
  0x10   :  { %32 = vsyncpa [#allocation15], 0 }
  0x11   :  { %34 = vsyncpa [#allocation15 + $0x1], 0  ;;  %s3810_s24 = smov 0   ;;  %s3812_s25 = smov 0  }
  0x12   :  { %s3814_s26 = smov 0   ;;  %s3816_s27 = smov 0  }
  0x13 LB: > { %4379 = sst [smem:[#allocation22_spill]] %s3692_s24  ;;  %s3831_s28 = sadd.s32 4294967295, %s3704_s27   ;;  %s3704_s27 = sphi %s3816_s27, %s4403_s27   ;;  %s3700_s26 = sphi %s3814_s26, %s4405_s26   ;;  %s3696_s25 = sphi %s3812_s25, %s4407_s25   ;;  %s3692_s24 = sphi %s3810_s24, %s4406_s24  }
  0x14   : > { %4380 = sst [smem:[#allocation23_spill]] %s3700_s26  ;;  %s4361_s29 = sadd.s32 4294967294, %s3704_s27  }
  0x15   : > { %4381 = sst [smem:[#allocation24_spill]] %s3704_s27  ;;  %s3835_s0 = sadd.s32 1, %s3704_s27  }
  0x16   : > { %4382 = sst [smem:[#allocation25_spill]] %s3835_s0  ;;  %s356_s30 = sadd.s32 1, %s3700_s26 }
  0x17   : > { %s353_s18 = ssub.s32 %s3704_s27, %s3835_s0  ;;  %p366_p0 = scmp.ne.s32.totalorder %s3700_s26, %s3696_s25 }
  0x18   : > { %p354_p1 = scmp.eq.s32.totalorder %s353_s18, 0  ;;  %p367_p2 = scmp.eq.s32.totalorder %s3831_s28, 1 }
  0x19   : > { %p372_p3 = scmp.ne.s32.totalorder %s3696_s25, %s3692_s24  ;;  %p373_p4 = scmp.eq.s32.totalorder %s4361_s29, 1 }
  0x1a   : > { %s3848_s19 = scalar_select %p354_p1, %s3700_s26, %s356_s30  }
  0x1b   : > { %p3850_p5 = por %p367_p2, %p366_p0  ;;  %p3854_p6 = por %p373_p4, %p372_p3 }
  0x1c   : > { %4383 = sst [smem:[#allocation26_spill]] %s3848_s19  ;;  %p2653_p7 = scmp.ge.s32.totalorder %s3704_s27, 1 }
  0x1d   : > { %s4385_s20 = scalar_select %p3854_p6, 1, 0 }
  0x1e   : > { %p458_p8 = scmp.lt.s32.totalorder %s3704_s27, 3  ;;  %p3285_p9 = scmp.eq.s32.totalorder %s3831_s28, 0 }
  0x1f   : > { %4386 = sst [smem:[#allocation27_spill]] %s4385_s20  ;;  %s3706_s22 = smov [#allocation5]  }
  0x20   : > { %p3861_p10 = pnand %p2653_p7, %p458_p8  ;;  %s504_s23 = sshll.u32 %s3706_s22, 4  ;;  %s505_s23 = int_to_ptr.vmem [resolvable:$true] %s504_s23 }
  0x21   : > { %s3707_s18 = smov [#allocation2]   ;;  %s3708_s19 = smov [#allocation7]  }
  0x22   : > { %p3259_p11 = pneg %p3861_p10  ;;  %s488_s29 = sshll.u32 %s3707_s18, 4  ;;  %s489_s29 = int_to_ptr.vmem [resolvable:$true] %s488_s29 }
  0x23   : > { %s517_s26 = sshll.u32 %s3708_s19, 4  ;;  %s3453_s0 = scalar_lea.vmem %s505_s23, 1024  ;;  %s518_s26 = int_to_ptr.vmem [resolvable:$true] %s517_s26 }
  0x24   : > { %p3869_p12 = pnand %p3285_p9, %p3259_p11  ;;  %p3454_p0 = scmp.ne.s32.totalorder %s505_s23, %s3453_s0 }
  0x25   : > { %p3461_p3 = scmp.lt.s32.totalorder %s505_s23, %s505_s23  ;;  %p3462_p4 = scmp.lt.s32.totalorder %s3453_s0, %s3453_s0 }
  0x26   : > { %p3444_p13 = pneg %p3869_p12 }
  0x27   : > { %p3463_p7 = por %p3462_p4, %p3461_p3 }
  0x28   : > { %p3456_p1 = pnand %p3454_p0, %p3444_p13 }
  0x2a   : > { %p3457_p2 = pneg %p3456_p1 }
  0x2c   : > { %p3464_p8 = pnand %p3463_p7, %p3457_p2 }
  0x2e   : > { %3467 = shalt.err (!%p3464_p8)
}
  0x2f   : > { %s3709_s22 = smov 64   ;;  %s3710_s18 = smov 4  }
  0x30   : > { %3265 = dma.hbm_to_vmem [thread:$0]  (!%p3869_p12), %s4354_s11, 1024, %s505_s23, [#allocation6], %s3709_s22, %s3709_s22, %s3710_s18  }
  0x31   : > { %s3479_s24 = scalar_lea.vmem %s489_s29, 256  ;;  %p3487_p2 = scmp.lt.s32.totalorder %s489_s29, %s489_s29 }
  0x32   : > { %p3480_p11 = scmp.ne.s32.totalorder %s489_s29, %s3479_s24  ;;  %p3488_p3 = scmp.lt.s32.totalorder %s3479_s24, %s3479_s24 }
  0x34   : > { %p3482_p0 = pnand %p3480_p11, %p3444_p13  ;;  %p3489_p4 = por %p3488_p3, %p3487_p2 }
  0x36   : > { %p3483_p1 = pneg %p3482_p0 }
  0x38   : > { %p3490_p7 = pnand %p3489_p4, %p3483_p1 }
  0x3a   : > { %3493 = shalt.err (!%p3490_p7)
}
  0x3b   : > { %3262 = dma.hbm_to_vmem [thread:$0]  (!%p3869_p12), %s4352_s9, 256, %s489_s29, [#allocation3], %s3709_s22, %s3709_s22, %s3710_s18  }
  0x3c   : > { %s3505_s20 = scalar_lea.vmem %s518_s26, 1024  ;;  %p3513_p2 = scmp.lt.s32.totalorder %s518_s26, %s518_s26 }
  0x3d   : > { %p3506_p8 = scmp.ne.s32.totalorder %s518_s26, %s3505_s20  ;;  %p3514_p1 = scmp.lt.s32.totalorder %s3505_s20, %s3505_s20 }
  0x3f   : > { %p3508_p11 = pnand %p3506_p8, %p3444_p13  ;;  %p3515_p3 = por %p3514_p1, %p3513_p2 }
  0x41   : > { %p3509_p0 = pneg %p3508_p11 }
  0x43   : > { %p3516_p4 = pnand %p3515_p3, %p3509_p0 }
  0x45   : > { %3519 = shalt.err (!%p3516_p4)
}
  0x46   : > { %3268 = dma.hbm_to_vmem [thread:$0]  (!%p3869_p12), %s4355_s12, 1024, %s518_s26, [#allocation6], %s3709_s22, %s3709_s22, %s3710_s18  }
  0x47   : > { %s3711_s29 = smov [#allocation8]  }
  0x48   : > { %s530_s23 = sshll.u32 %s3711_s29, 4  ;;  %s531_s23 = int_to_ptr.vmem [resolvable:$true] %s530_s23 }
  0x49   : > { %s3531_s19 = scalar_lea.vmem %s531_s23, 1024  ;;  %p3539_p0 = scmp.lt.s32.totalorder %s531_s23, %s531_s23 }
  0x4a   : > { %p3532_p7 = scmp.ne.s32.totalorder %s531_s23, %s3531_s19  ;;  %p3540_p2 = scmp.lt.s32.totalorder %s3531_s19, %s3531_s19 }
  0x4c   : > { %p3534_p8 = pnand %p3532_p7, %p3444_p13  ;;  %p3541_p1 = por %p3540_p2, %p3539_p0 }
  0x4e   : > { %p3535_p11 = pneg %p3534_p8 }
  0x50   : > { %p3542_p3 = pnand %p3541_p1, %p3535_p11 }
  0x52   : > { %3545 = shalt.err (!%p3542_p3)
}
  0x53   : > { %3271 = dma.hbm_to_vmem [thread:$0]  (!%p3869_p12), %s4356_s13, 1024, %s531_s23, [#allocation9], %s3709_s22, %s3709_s22, %s3710_s18  }
  0x54   : > { %570 = sbr.rel (%p3861_p10) target bundleno = 2147 (0x863), region = 76 }
  0x59   : > { %3667 = dma.done.wait (%p3285_p9), [#allocation3], 256  }
  0x5a   : > { %3669 = vsyncadd (%p3285_p9), [#allocation3], 4294967040 }
  0x5b   : > { %3671 = dma.done.wait (%p3285_p9), [#allocation6], 2048  }
  0x5c   : > { %3673 = vsyncadd (%p3285_p9), [#allocation6], 4294965248 }
  0x5d   : > { %3675 = dma.done.wait (%p3285_p9), [#allocation9], 1024  }
  0x5e   : > { %3677 = vsyncadd (%p3285_p9), [#allocation9], 4294966272  ;;  %p659_p10 = scmp.lt.s32.totalorder %s3831_s28, 1  ;;  %s4389_s20 = sld [smem:[#allocation29_spill]]  ;;  %vm731_vm0 = vcmask 261120   ;;  %vm872_vm1 = vcmask 523264  }
  0x5f   : > { %s4390_s23 = sld [smem:[#allocation28_spill]] }
  0x60   : > { %s660_s21 = scalar_select %p659_p10, %s3831_s28, 1 }
  0x61   : > { %s4391_s3 = sld [smem:[#allocation31_spill]] }
  0x62   : > { %s3935_s30 = sshll.u32 %s660_s21, 5  ;;  %s4392_s2 = sld [smem:[#allocation30_spill]] }
  0x63   : > { %s4393_s5 = sld [smem:[#allocation33_spill]] }
  0x64   : > { %s668_s24 = scalar_lea.vmem %s4389_s20, %s3935_s30  ;;  %s4394_s6 = sld [smem:[#allocation34_spill]] }
  0x65   : > { %v3336_v0 = vld [vmem:[%s668_s24 + $0x18] sm:$0xff]   ;;  %v3337_v1 = vld [vmem:[%s668_s24 + $0x10] sm:$0xff]   ;;  %s663_s19 = scalar_lea.vmem %s4390_s23, %s3935_s30  ;;  %v3338_v3 = vld [vmem:[%s668_s24 + $0x8] sm:$0xff]   ;;  %s4395_s7 = sld [smem:[#allocation35_spill]] }
  0x66   : > { %3231 = vmatprep.subr.msk.bf16.mxu0 %vm731_vm0, %v3336_v0  ;;  %v754_v2 = vsel %vm731_vm0, %v3336_v0, 0  ;;  %v3339_v4 = vld [vmem:[%s668_s24] sm:$0xff]   ;;  %v751_v6 = vsel %vm731_vm0, %v3337_v1, 0  ;;  %v748_v7 = vsel %vm731_vm0, %v3338_v3, 0  ;;  %v3341_v10 = vld [vmem:[%s663_s19 + $0x8] sm:$0xff]   ;;  %v3342_v11 = vld [vmem:[%s663_s19 + $0x10] sm:$0xff]  }
  0x67   : > { %2988 = vmatpush3.bf16.xpose.msra.mxu0 %v754_v2  ;;  %v3340_v5 = vld [vmem:[%s663_s19] sm:$0xff]   ;;  %v745_v8 = vsel %vm731_vm0, %v3339_v4, 0  ;;  %v3344_v9 = vld [vmem:[%s4391_s3 + $0x18] sm:$0xff]   ;;  %v3345_v13 = vld [vmem:[%s4391_s3 + $0x10] sm:$0xff]   ;;  %s4396_s4 = sld [smem:[#allocation32_spill]] }
  0x68   : > { %3232 = vmatprep.subr.msk.bf16.mxu0 %vm731_vm0, %v3337_v1  ;;  %2995 = vmatprep.mubr.msk.bf16.mxu0 %vm731_vm0, %v3340_v5  ;;  %v3343_v12 = vld [vmem:[%s663_s19 + $0x18] sm:$0xff]   ;;  %s3964_s18 = scalar_lea.vmem %s4392_s2, %s3935_s30  ;;  %v3346_v14 = vld [vmem:[%s4391_s3 + $0x8] sm:$0xff]   ;;  %v3347_v15 = vld [vmem:[%s4391_s3] sm:$0xff]   ;;  %s2360_s19 = sand.u32 1, %s3831_s28  }
  0x69   : > { %3003 = vmatprep.subr.bf16.mxu1 %v3344_v9  ;;  %v3348_v16 = vld [vmem:[%s4393_s5 + $0x38] sm:$0xff]   ;;  %v3350_v34 = vld [vmem:[%s4393_s5 + $0x30] sm:$0xff]   ;;  %v3352_v38 = vld [vmem:[%s4393_s5 + $0x28] sm:$0xff]  }
  0x6a   : > { %3004 = vmatpush3.bf16.msra.mxu1 %v3344_v9  ;;  %v3349_v17 = vld [vmem:[%s4394_s6 + $0x38] sm:$0xff]   ;;  %v3351_v18 = vld [vmem:[%s4394_s6 + $0x30] sm:$0xff]   ;;  %v3353_v19 = vld [vmem:[%s4394_s6 + $0x28] sm:$0xff]  }
  0x6b   : > { %3005 = vmatprep.subr.bf16.mxu1 %v3345_v13  ;;  %v3355_v20 = vld [vmem:[%s4394_s6 + $0x20] sm:$0xff]   ;;  %v3357_v21 = vld [vmem:[%s4394_s6 + $0x18] sm:$0xff]   ;;  %v3358_v46 = vld [vmem:[%s4393_s5 + $0x10] sm:$0xff]  }
  0x6c   : > { %v3354_v44 = vld [vmem:[%s4393_s5 + $0x20] sm:$0xff]   ;;  %v3356_v45 = vld [vmem:[%s4393_s5 + $0x18] sm:$0xff]   ;;  %v3359_v47 = vld [vmem:[%s4394_s6 + $0x10] sm:$0xff]  }
  0x6d   : > { %v3360_v48 = vld [vmem:[%s4393_s5 + $0x8] sm:$0xff]   ;;  %v3362_v50 = vld [vmem:[%s4393_s5] sm:$0xff]   ;;  %v3364_v52 = vld [vmem:[%s4395_s7 + $0x38] sm:$0xff]  }
  0x6e   : > { %3006 = vmatpush3.bf16.msra.mxu1 %v3345_v13  ;;  %v3361_v49 = vld [vmem:[%s4394_s6 + $0x8] sm:$0xff]   ;;  %v3363_v51 = vld [vmem:[%s4394_s6] sm:$0xff]   ;;  %v3365_v2 = vld [vmem:[%s4395_s7 + $0x30] sm:$0xff]  }
  0x6f   : > { %2990 = vmatpush3.bf16.xpose.msra.mxu0 %v751_v6  ;;  %3007 = vmatprep.subr.bf16.mxu1 %v3346_v14  ;;  %v2686_v56 = vld [vmem:[%s4396_s4] ss:$0 sm:$0xff]  ;;  %v3366_v6 = vld [vmem:[%s4395_s7 + $0x28] sm:$0xff]   ;;  %v3368_v13 = vld [vmem:[%s4395_s7 + $0x18] sm:$0xff]  }
  0x70   : > { %3233 = vmatprep.subr.msk.bf16.mxu0 %vm731_vm0, %v3338_v3 }
  0x72   : > { %3008 = vmatpush3.bf16.msra.mxu1 %v3346_v14  ;;  %v3369_v14 = vld [vmem:[%s4395_s7 + $0x10] sm:$0xff]  }
  0x73   : > { %3009 = vmatprep.subr.bf16.mxu1 %v3347_v15 }
  0x76   : > { %3010 = vmatpush3.bf16.msra.mxu1 %v3347_v15  ;;  %v3370_v15 = vld [vmem:[%s4395_s7 + $0x8] sm:$0xff]  }
  0x77   : > { %2992 = vmatpush3.bf16.xpose.msra.mxu0 %v748_v7  ;;  %3019 = vmatprep.subr.bf16.mxu1 %v3348_v16 }
  0x78   : > { %3234 = vmatprep.subr.msk.bf16.mxu0 %vm731_vm0, %v3339_v4 }
  0x7f   : > { %2994 = vmatpush3.bf16.xpose.msra.mxu0 %v745_v8 }
  0x80   : > { %3043 = vmatprep.subr.bf16.mxu0 %v3349_v17 }
  0x86   : > { %2996 = vmatmul.mubr.msk.bf16.vlgmr.msra.gmra.mxu0 %vm731_vm0, %v3341_v10 }
  0x87   : > { %2999 = vmatprep.mubr.msk.bf16.mxu0 %vm731_vm0, %v3342_v11  ;;  %3044 = vmatpush3.bf16.msra.mxu0 %v3349_v17 }
  0x88   : > { %3045 = vmatprep.subr.bf16.mxu0 %v3351_v18 }
  0x8b   : > { %3046 = vmatpush3.bf16.msra.mxu0 %v3351_v18 }
  0x8c   : > { %3047 = vmatprep.subr.bf16.mxu0 %v3353_v19 }
  0x8e   : > { %3000 = vmatmul.mubr.msk.bf16.gmra.mxu0 %vm731_vm0, %v3343_v12  ;;  %v3367_v12 = vld [vmem:[%s4395_s7 + $0x20] sm:$0xff]  }
  0x8f   : > { %3048 = vmatpush3.bf16.msra.mxu0 %v3353_v19 }
  0x90   : > { %3049 = vmatprep.subr.bf16.mxu0 %v3355_v20 }
  0x93   : > { %3050 = vmatpush3.bf16.msra.mxu0 %v3355_v20 }
  0x94   : > { %3051 = vmatprep.subr.bf16.mxu0 %v3357_v21 }
  0x97   : > { %3052 = vmatpush3.bf16.msra.mxu0 %v3357_v21 }
  0x98   : > { %3053 = vmatprep.subr.bf16.mxu0 %v3359_v47 }
  0x9b   : > { %3054 = vmatpush3.bf16.msra.mxu0 %v3359_v47 }
  0x9c   : > { %3055 = vmatprep.subr.bf16.mxu0 %v3361_v49 }
  0x9f   : > { %3056 = vmatpush3.bf16.msra.mxu0 %v3361_v49 }
  0xa0   : > { %3057 = vmatprep.subr.bf16.mxu0 %v3363_v51 }
  0xa3   : > { %3058 = vmatpush3.bf16.msra.mxu0 %v3363_v51 }
 0x146   : > { %v2997_v22 = vpop.f32.mrf.mxu0 }
 0x147   : > { %v823_v29 = vmul.f32 0.17677669, %v2997_v22 }
 0x148   : > { %v790_v23 = vpop.f32.mrf.mxu0 }
 0x149   : > { %v821_v27 = vmul.f32 0.17677669, %v790_v23 }
 0x14a   : > { %v2998_v24 = vpop.f32.mrf.mxu0 }
 0x14b   : > { %v824_v25 = vmul.f32 0.17677669, %v2998_v24 }
 0x14c   : > { %v793_v26 = vpop.f32.mrf.mxu0 }
 0x14d   : > { %v822_v28 = vmul.f32 0.17677669, %v793_v26  ;;  %v830_v32 = vpack.c.bf16 %v824_v25, %v823_v29 }
 0x14e   : > { %v3001_v30 = vpop.f32.mrf.mxu0 }
 0x14f   : > { %v829_v31 = vpack.c.bf16 %v822_v28, %v821_v27  ;;  %v827_v41 = vmul.f32 0.17677669, %v3001_v30 }
 0x150   : > { %v806_v33 = vpop.f32.mrf.mxu0 }
 0x151   : > { %3011 = vmatprep.mubr.msk.bf16.mxu1 %vm872_vm1, %v829_v31  ;;  %v825_v39 = vmul.f32 0.17677669, %v806_v33 }
 0x152   : > { %v3002_v35 = vpop.f32.mrf.mxu0  ;;  %3012 = vmatmul.mubr.msk.bf16.vlgmr.msra.gmra.mxu1 %vm872_vm1, %v830_v32 }
 0x153   : > { %3020 = vmatpush3.bf16.msra.mxu1 %v3348_v16  ;;  %v828_v36 = vmul.f32 0.17677669, %v3002_v35  ;;  %v3371_v16 = vld [vmem:[%s4395_s7] sm:$0xff]  }
 0x154   : > { %v809_v37 = vpop.f32.mrf.mxu0  ;;  %3021 = vmatprep.subr.bf16.mxu1 %v3350_v34 }
 0x155   : > { %v826_v40 = vmul.f32 0.17677669, %v809_v37  ;;  %v832_v43 = vpack.c.bf16 %v828_v36, %v827_v41 }
 0x157   : > { %v831_v42 = vpack.c.bf16 %v826_v40, %v825_v39  ;;  %3022 = vmatpush3.bf16.msra.mxu1 %v3350_v34 }
 0x158   : > { %3023 = vmatprep.subr.bf16.mxu1 %v3352_v38 }
 0x159   : > { %3015 = vmatprep.mubr.msk.bf16.mxu1 %vm872_vm1, %v831_v42 }
 0x15a   : > { %3016 = vmatmul.mubr.msk.bf16.gmra.mxu1 %vm872_vm1, %v832_v43 }
 0x15b   : > { %3024 = vmatpush3.bf16.msra.mxu1 %v3352_v38 }
 0x15c   : > { %3025 = vmatprep.subr.bf16.mxu1 %v3354_v44 }
 0x15f   : > { %3026 = vmatpush3.bf16.msra.mxu1 %v3354_v44 }
 0x160   : > { %3027 = vmatprep.subr.bf16.mxu1 %v3356_v45 }
 0x163   : > { %3028 = vmatpush3.bf16.msra.mxu1 %v3356_v45 }
 0x164   : > { %3029 = vmatprep.subr.bf16.mxu1 %v3358_v46 }
 0x167   : > { %3030 = vmatpush3.bf16.msra.mxu1 %v3358_v46 }
 0x168   : > { %3031 = vmatprep.subr.bf16.mxu1 %v3360_v48 }
 0x16b   : > { %3032 = vmatpush3.bf16.msra.mxu1 %v3360_v48 }
 0x16c   : > { %3033 = vmatprep.subr.bf16.mxu1 %v3362_v50 }
 0x16f   : > { %3034 = vmatpush3.bf16.msra.mxu1 %v3362_v50 }
 0x170   : > { %3067 = vmatprep.subr.bf16.mxu1 %v3364_v52 }
 0x212   : > { %v3013_v53 = vpop.f32.mrf.mxu1 }
 0x213   : > { %v4039_v61 = vadd.f32 %v3013_v53, %v2686_v56 }
 0x214   : > { %v919_v54 = vpop.f32.mrf.mxu1 }
 0x215   : > { %v4035_v59 = vadd.f32 %v2686_v56, %v919_v54 }
 0x216   : > { %v3014_v55 = vpop.f32.mrf.mxu1 }
 0x217   : > { %v4033_v57 = vadd.f32 %v3014_v55, %v2686_v56 }
 0x218   : > { %v922_v58 = vpop.f32.mrf.mxu1 }
 0x219   : > { %v4037_v60 = vadd.f32 %v2686_v56, %v922_v58  ;;  %v951_v0 = vpack.c.bf16 %v4033_v57, %v4039_v61 }
 0x21a   : > { %v3017_v62 = vpop.f32.mrf.mxu1 }
 0x21b   : > { %v950_v63 = vpack.c.bf16 %v4037_v60, %v4035_v59  ;;  %v4057_v9 = vadd.f32 %v3017_v62, %v2686_v56 }
 0x21c   : > { %v935_v1 = vpop.f32.mrf.mxu1 }
 0x21d   : > { %3035 = vmatprep.mubr.bf16.mxu1 %v950_v63  ;;  %3059 = vmatprep.mubr.bf16.mxu0 %v950_v63  ;;  %v4053_v7 = vadd.f32 %v2686_v56, %v935_v1 }
 0x21e   : > { %v3018_v3 = vpop.f32.mrf.mxu1  ;;  %3036 = vmatmul.mubr.bf16.vlgmr.msra.gmra.mxu1 %v951_v0  ;;  %3060 = vmatmul.mubr.bf16.vlgmr.msra.gmra.mxu0 %v951_v0 }
 0x21f   : > { %3068 = vmatpush3.bf16.msra.mxu1 %v3364_v52  ;;  %v4048_v4 = vadd.f32 %v3018_v3, %v2686_v56 }
 0x220   : > { %v938_v5 = vpop.f32.mrf.mxu1  ;;  %3069 = vmatprep.subr.bf16.mxu1 %v3365_v2 }
 0x221   : > { %v4055_v8 = vadd.f32 %v2686_v56, %v938_v5  ;;  %v953_v11 = vpack.c.bf16 %v4048_v4, %v4057_v9 }
 0x223   : > { %v952_v10 = vpack.c.bf16 %v4055_v8, %v4053_v7  ;;  %3070 = vmatpush3.bf16.msra.mxu1 %v3365_v2 }
 0x224   : > { %3071 = vmatprep.subr.bf16.mxu1 %v3366_v6 }
 0x225   : > { %3039 = vmatprep.mubr.bf16.mxu1 %v952_v10  ;;  %3063 = vmatprep.mubr.bf16.mxu0 %v952_v10 }
 0x226   : > { %3040 = vmatmul.mubr.bf16.gmra.mxu1 %v953_v11  ;;  %3064 = vmatmul.mubr.bf16.gmra.mxu0 %v953_v11 }
 0x227   : > { %3072 = vmatpush3.bf16.msra.mxu1 %v3366_v6  ;;  %3083 = vmatprep.mubr.bf16.mxu1 %v950_v63 }
 0x228   : > { %3073 = vmatprep.subr.bf16.mxu1 %v3367_v12 }
 0x22b   : > { %3074 = vmatpush3.bf16.msra.mxu1 %v3367_v12 }
 0x22c   : > { %3075 = vmatprep.subr.bf16.mxu1 %v3368_v13 }
 0x22f   : > { %3076 = vmatpush3.bf16.msra.mxu1 %v3368_v13 }
 0x230   : > { %3077 = vmatprep.subr.bf16.mxu1 %v3369_v14 }
 0x233   : > { %3078 = vmatpush3.bf16.msra.mxu1 %v3369_v14 }
 0x234   : > { %3079 = vmatprep.subr.bf16.mxu1 %v3370_v15 }
 0x237   : > { %3080 = vmatpush3.bf16.msra.mxu1 %v3370_v15 }
 0x238   : > { %3081 = vmatprep.subr.bf16.mxu1 %v3371_v16 }
 0x23b   : > { %3082 = vmatpush3.bf16.msra.mxu1 %v3371_v16 }
 0x23e   : > { %3084 = vmatmul.mubr.bf16.vlgmr.msra.gmra.mxu1 %v951_v0 }
 0x23f   : > { %3087 = vmatprep.mubr.bf16.mxu1 %v952_v10 }
 0x246   : > { %3088 = vmatmul.mubr.bf16.gmra.mxu1 %v953_v11 }
 0x2de   : > { %v3037_v17 = vpop.f32.mrf.mxu1  ;;  %v3061_v18 = vpop.f32.mrf.mxu0 }
 0x2e0   : > { %v1052_v19 = vpop.f32.mrf.mxu1  ;;  %v1181_v20 = vpop.f32.mrf.mxu0 }
 0x2e2   : > { %v3038_v21 = vpop.f32.mrf.mxu1  ;;  %v3062_v22 = vpop.f32.mrf.mxu0 }
 0x2e3   : > { %v1346_v34 = vpack.c.bf16 %v3062_v22, %v3061_v18  ;;  %v1342_v45 = vpack.c.bf16 %v3038_v21, %v3037_v17 }
 0x2e4   : > { %v1055_v23 = vpop.f32.mrf.mxu1  ;;  %v1184_v24 = vpop.f32.mrf.mxu0 }
 0x2e5   : > { %v1341_v25 = vpack.c.bf16 %v1055_v23, %v1052_v19  ;;  %v1345_v37 = vpack.c.bf16 %v1184_v24, %v1181_v20 }
 0x2e6   : > { %v3065_v26 = vpop.f32.mrf.mxu0  ;;  %v3041_v32 = vpop.f32.mrf.mxu1 }
 0x2e7   : > { %3099 = vmatprep.mubr.bf16.mxu0 %v1341_v25 }
 0x2e8   : > { %v1197_v27 = vpop.f32.mrf.mxu0  ;;  %v1068_v33 = vpop.f32.mrf.mxu1 }
 0x2ea   : > { %v3066_v28 = vpop.f32.mrf.mxu0  ;;  %v3042_v35 = vpop.f32.mrf.mxu1 }
 0x2eb   : > { %v1348_v29 = vpack.c.bf16 %v3066_v28, %v3065_v26  ;;  %v1344_v51 = vpack.c.bf16 %v3042_v35, %v3041_v32 }
 0x2ec   : > { %v1200_v30 = vpop.f32.mrf.mxu0  ;;  %v1071_v36 = vpop.f32.mrf.mxu1 }
 0x2ed   : > { %v1347_v31 = vpack.c.bf16 %v1200_v30, %v1197_v27  ;;  %3091 = vmatprep.subr.bf16.mxu0 %v1348_v29  ;;  %v1343_v47 = vpack.c.bf16 %v1071_v36, %v1068_v33 }
 0x2ee   : > { %3092 = vmatpush3.bf16.xpose.msra.mxu0 %v1348_v29 }
 0x2ef   : > { %3093 = vmatprep.subr.bf16.mxu0 %v1347_v31 }
 0x2f6   : > { %3094 = vmatpush3.bf16.xpose.msra.mxu0 %v1347_v31 }
 0x2f7   : > { %3095 = vmatprep.subr.bf16.mxu0 %v1346_v34 }
 0x2fe   : > { %v3085_v38 = vpop.f32.mrf.mxu1  ;;  %3096 = vmatpush3.bf16.xpose.msra.mxu0 %v1346_v34 }
 0x2ff   : > { %3097 = vmatprep.subr.bf16.mxu0 %v1345_v37 }
 0x300   : > { %v1310_v39 = vpop.f32.mrf.mxu1 }
 0x302   : > { %v3086_v40 = vpop.f32.mrf.mxu1 }
 0x303   : > { %v1515_v50 = vpack.c.bf16 %v3086_v40, %v3085_v38 }
 0x304   : > { %v1313_v41 = vpop.f32.mrf.mxu1 }
 0x305   : > { %v1514_v52 = vpack.c.bf16 %v1313_v41, %v1310_v39 }
 0x306   : > { %v3089_v42 = vpop.f32.mrf.mxu1  ;;  %3098 = vmatpush3.bf16.xpose.msra.mxu0 %v1345_v37 }
 0x308   : > { %v1326_v43 = vpop.f32.mrf.mxu1 }
 0x30a   : > { %v3090_v44 = vpop.f32.mrf.mxu1 }
 0x30b   : > { %v1517_v46 = vpack.c.bf16 %v3090_v44, %v3089_v42 }
 0x30c   : > { %v1329_v48 = vpop.f32.mrf.mxu1 }
 0x30d   : > { %v1516_v49 = vpack.c.bf16 %v1329_v48, %v1326_v43  ;;  %3107 = vmatprep.subr.bf16.mxu1 %v1517_v46  ;;  %3100 = vmatmul.mubr.bf16.vlgmr.msra.gmra.mxu0 %v1342_v45 }
 0x30e   : > { %3108 = vmatpush3.bf16.msra.mxu1 %v1517_v46  ;;  %3103 = vmatprep.mubr.bf16.mxu0 %v1343_v47 }
 0x30f   : > { %3109 = vmatprep.subr.bf16.mxu1 %v1516_v49 }
 0x312   : > { %3110 = vmatpush3.bf16.msra.mxu1 %v1516_v49 }
 0x313   : > { %3111 = vmatprep.subr.bf16.mxu1 %v1515_v50 }
 0x315   : > { %3104 = vmatmul.mubr.bf16.gmra.mxu0 %v1344_v51 }
 0x316   : > { %3112 = vmatpush3.bf16.msra.mxu1 %v1515_v50 }
 0x317   : > { %3113 = vmatprep.subr.bf16.mxu1 %v1514_v52 }
 0x31a   : > { %3114 = vmatpush3.bf16.msra.mxu1 %v1514_v52 }
 0x3cd   : > { %v3101_v53 = vpop.f32.mrf.mxu0 }
 0x3ce   : > { %v1416_v54 = vmul.f32 0.088388346, %v3101_v53 }
 0x3cf   : > { %v1383_v55 = vpop.f32.mrf.mxu0 }
 0x3d0   : > { %v1414_v56 = vmul.f32 0.088388346, %v1383_v55  ;;  %v1428_v58 = vsel %vm872_vm1, %v1416_v54, -inf }
 0x3d1   : > { %1429 = vmax.xlane.f32.xlu1 %v1428_v58  ;;  %v3102_v62 = vpop.f32.mrf.mxu0 }
 0x3d2   : > { %v1417_v63 = vmul.f32 0.088388346, %v3102_v62  ;;  %v1422_v0 = vsel %vm872_vm1, %v1414_v56, -inf }
 0x3d3   : > { %1423 = vmax.xlane.f32.xlu0 %v1422_v0  ;;  %v1386_v1 = vpop.f32.mrf.mxu0 }
 0x3d4   : > { %v1415_v2 = vmul.f32 0.088388346, %v1386_v1  ;;  %v1431_v3 = vsel %vm872_vm1, %v1417_v63, -inf  ;;  %v3372_v1 = vld [vmem:[%s4351_s8 + $0x38] sm:$0xff]  }
 0x3d5   : > { %1432 = vmax.xlane.f32.xlu1 %v1431_v3  ;;  %v3105_v5 = vpop.f32.mrf.mxu0  ;;  %3123 = vmatprep.subr.bf16.mxu0 %v3372_v1  ;;  %v3374_v3 = vld [vmem:[%s4351_s8 + $0x28] sm:$0xff]  }
 0x3d6   : > { %v1425_v6 = vsel %vm872_vm1, %v1415_v2, -inf  ;;  %v1420_v13 = vmul.f32 0.088388346, %v3105_v5  ;;  %3124 = vmatpush3.bf16.msra.mxu0 %v3372_v1  ;;  %v3375_v5 = vld [vmem:[%s4351_s8 + $0x20] sm:$0xff]  }
 0x3d7   : > { %1426 = vmax.xlane.f32.xlu0 %v1425_v6  ;;  %v1399_v10 = vpop.f32.mrf.mxu0  ;;  %v3376_v6 = vld [vmem:[%s4351_s8 + $0x18] sm:$0xff]  }
 0x3d8   : > { %v1418_v11 = vmul.f32 0.088388346, %v1399_v10  ;;  %v1440_v18 = vsel %vm872_vm1, %v1420_v13, -inf  ;;  %v3377_v10 = vld [vmem:[%s4351_s8 + $0x10] sm:$0xff]  }
 0x3d9   : > { %v3106_v12 = vpop.f32.mrf.mxu0 }
 0x3da   : > { %v1434_v14 = vsel %vm872_vm1, %v1418_v11, -inf  ;;  %v1421_v17 = vmul.f32 0.088388346, %v3106_v12 }
 0x3db   : > { %1435 = vmax.xlane.f32.xlu0 %v1434_v14  ;;  %v1402_v15 = vpop.f32.mrf.mxu0 }
 0x3dc   : > { %v1419_v16 = vmul.f32 0.088388346, %v1402_v15  ;;  %v1443_v20 = vsel %vm872_vm1, %v1421_v17, -inf }
 0x3de   : > { %v1437_v19 = vsel %vm872_vm1, %v1419_v16, -inf }
 0x3df   : > { %1441 = vmax.xlane.f32.xlu0 %v1440_v18  ;;  %1438 = vmax.xlane.f32.xlu1 %v1437_v19 }
 0x3e3   : > { %1444 = vmax.xlane.f32.xlu1 %v1443_v20 }
 0x45a   : > { %v1430_v21 = vpop.xlane.xlu1 %1429 }
 0x45b   : > { %v1448_v22 = vsub.f32 %v1416_v54, %v1430_v21 }
 0x45c   : > { %v1424_v23 = vpop.xlane.xlu0 %1423 }
 0x45d   : > { %v1446_v24 = vsub.f32 %v1414_v56, %v1424_v23  ;;  %v1458_v26 = vmul.f32 1.442695, %v1448_v22 }
 0x45e   : > { %v1433_v25 = vpop.xlane.xlu1 %1432 }
 0x45f   : > { %v1454_v27 = vmul.f32 1.442695, %v1446_v24  ;;  %v1449_v28 = vsub.f32 %v1417_v63, %v1433_v25 }
 0x460   : > { %v1427_v29 = vpop.xlane.xlu0 %1426 }
 0x461   : > { %3410 = vpow2.f32 %v1454_v27  ;;  %v1447_v30 = vsub.f32 %v1415_v2, %v1427_v29  ;;  %v1460_v31 = vmul.f32 1.442695, %v1449_v28  ;;  %v3373_v2 = vld [vmem:[%s4351_s8 + $0x30] sm:$0xff]  }
 0x462   : > { %3412 = vpow2.f32 %v1458_v26  ;;  %3125 = vmatprep.subr.bf16.mxu0 %v3373_v2 }
 0x463   : > { %v1456_v32 = vmul.f32 1.442695, %v1447_v30  ;;  %3126 = vmatpush3.bf16.msra.mxu0 %v3373_v2  ;;  %v3387_v2 = vld [vmem:[#allocation7 + $0x20] sm:$0xff]  }
 0x464   : > { %v1436_v33 = vpop.xlane.xlu0 %1435  ;;  %3127 = vmatprep.subr.bf16.mxu0 %v3374_v3 }
 0x465   : > { %3414 = vpow2.f32 %v1456_v32  ;;  %v1450_v34 = vsub.f32 %v1418_v11, %v1436_v33 }
 0x466   : > { %3416 = vpow2.f32 %v1460_v31 }
 0x467   : > { %v1462_v35 = vmul.f32 1.442695, %v1450_v34  ;;  %3128 = vmatpush3.bf16.msra.mxu0 %v3374_v3  ;;  %v3389_v3 = vld [vmem:[#allocation7 + $0x18] sm:$0xff]  }
 0x468   : > { %v1442_v36 = vpop.xlane.xlu0 %1441  ;;  %v1439_v37 = vpop.xlane.xlu1 %1438  ;;  %3129 = vmatprep.subr.bf16.mxu0 %v3375_v5 }
 0x469   : > { %3418 = vpow2.f32 %v1462_v35  ;;  %v1452_v38 = vsub.f32 %v1420_v13, %v1442_v36  ;;  %v1451_v39 = vsub.f32 %v1419_v16, %v1439_v37 }
 0x46b   : > { %v1466_v40 = vmul.f32 1.442695, %v1452_v38  ;;  %v1464_v41 = vmul.f32 1.442695, %v1451_v39  ;;  %3130 = vmatpush3.bf16.msra.mxu0 %v3375_v5  ;;  %v3378_v39 = vld [vmem:[%s4351_s8 + $0x8] sm:$0xff]   ;;  %v3391_v5 = vld [vmem:[#allocation7 + $0x10] sm:$0xff]  }
 0x46c   : > { %v1445_v42 = vpop.xlane.xlu1 %1444  ;;  %3131 = vmatprep.subr.bf16.mxu0 %v3376_v6 }
 0x46d   : > { %3420 = vpow2.f32 %v1466_v40  ;;  %v1453_v43 = vsub.f32 %v1421_v17, %v1445_v42  ;;  %v3379_v40 = vld [vmem:[%s4351_s8] sm:$0xff]   ;;  %v3381_v42 = vld [vmem:[#allocation7 + $0x38] sm:$0xff]  }
 0x46e   : > { %v4086_v44 = vpop.eup %3410  ;;  %3422 = vpow2.f32 %v1464_v41  ;;  %v3380_v41 = vld [vmem:[#allocation5 + $0x38] sm:$0xff]  }
 0x46f   : > { %v1468_v45 = vmul.f32 1.442695, %v1453_v43  ;;  %v1470_v46 = vsel %vm872_vm1, %v4086_v44, 0.0  ;;  %v4090_v47 = vpop.eup %3412  ;;  %3132 = vmatpush3.bf16.msra.mxu0 %v3376_v6  ;;  %v3382_v43 = vld [vmem:[#allocation5 + $0x30] sm:$0xff]   ;;  %3147 = vmatprep.subr.bf16.mxu1 %v3380_v41  ;;  %v3392_v6 = vld [vmem:[#allocation5 + $0x8] sm:$0xff]  }
 0x470   : > { %1471 = vadd.xlane.f32.xlu0 %v1470_v46  ;;  %v1476_v49 = vsel %vm872_vm1, %v4090_v47, 0.0  ;;  %3133 = vmatprep.subr.bf16.mxu0 %v3377_v10  ;;  %v3388_v46 = vld [vmem:[#allocation5 + $0x18] sm:$0xff]  }
 0x471   : > { %3424 = vpow2.f32 %v1468_v45  ;;  %v3386_v45 = vld [vmem:[#allocation5 + $0x20] sm:$0xff]  }
 0x472   : > { %v3415_v48 = vpop.eup %3414 }
 0x473   : > { %v1473_v50 = vsel %vm872_vm1, %v3415_v48, 0.0  ;;  %v3417_v51 = vpop.eup %3416  ;;  %3134 = vmatpush3.bf16.msra.mxu0 %v3377_v10  ;;  %v3393_v10 = vld [vmem:[#allocation7 + $0x8] sm:$0xff]  }
 0x474   : > { %1477 = vadd.xlane.f32.xlu0 %v1476_v49  ;;  %1474 = vadd.xlane.f32.xlu1 %v1473_v50  ;;  %v1479_v54 = vsel %vm872_vm1, %v3417_v51, 0.0 }
 0x475   : > { %3135 = vmatprep.subr.bf16.mxu0 %v3378_v39 }
 0x476   : > { %v3419_v52 = vpop.eup %3418 }
 0x477   : > { %v1482_v53 = vsel %vm872_vm1, %v3419_v52, 0.0  ;;  %3136 = vmatpush3.bf16.msra.mxu0 %v3378_v39 }
 0x478   : > { %1483 = vadd.xlane.f32.xlu0 %v1482_v53  ;;  %1480 = vadd.xlane.f32.xlu1 %v1479_v54 }
 0x479   : > { %3137 = vmatprep.subr.bf16.mxu0 %v3379_v40 }
 0x47a   : > { %v4097_v55 = vpop.eup %3420 }
 0x47b   : > { %v3423_v56 = vpop.eup %3422  ;;  %v1488_v58 = vsel %vm872_vm1, %v4097_v55, 0.0  ;;  %3138 = vmatpush3.bf16.msra.mxu0 %v3379_v40 }
 0x47c   : > { %1489 = vadd.xlane.f32.xlu0 %v1488_v58  ;;  %v1485_v62 = vsel %vm872_vm1, %v3423_v56, 0.0  ;;  %3171 = vmatprep.subr.bf16.mxu0 %v3381_v42 }
 0x47d   : > { %1486 = vadd.xlane.f32.xlu1 %v1485_v62  ;;  %v3385_v62 = vld [vmem:[#allocation7 + $0x28] sm:$0xff]  }
 0x47e   : > { %v3425_v63 = vpop.eup %3424 }
 0x47f   : > { %v1491_v0 = vsel %vm872_vm1, %v3425_v63, 0.0 }
 0x481   : > { %1492 = vadd.xlane.f32.xlu1 %v1491_v0 }
 0x4f9   : > { %v1472_v11 = vpop.xlane.xlu0 %1471 }
 0x4fa   : > { %3426 = vrcp.f32 %v1472_v11  ;;  %v3394_v11 = vld [vmem:[#allocation5] sm:$0xff]  }
 0x4fd   : > { %v1478_v12 = vpop.xlane.xlu0 %1477  ;;  %v1475_v13 = vpop.xlane.xlu1 %1474 }
 0x4fe   : > { %3428 = vrcp.f32 %v1475_v13  ;;  %v3396_v13 = vld [vmem:[#allocation2 + $0x8] sm:$0xff]  }
 0x4ff   : > { %3430 = vrcp.f32 %v1478_v12  ;;  %v3395_v12 = vld [vmem:[#allocation7] sm:$0xff]  }
 0x501   : > { %v1484_v14 = vpop.xlane.xlu0 %1483  ;;  %v1481_v15 = vpop.xlane.xlu1 %1480 }
 0x502   : > { %3432 = vrcp.f32 %v1481_v15 }
 0x503   : > { %3434 = vrcp.f32 %v1484_v14 }
 0x505   : > { %v1490_v16 = vpop.xlane.xlu0 %1489 }
 0x506   : > { %v1487_v17 = vpop.xlane.xlu1 %1486 }
 0x507   : > { %3436 = vrcp.f32 %v1487_v17  ;;  %v3427_v18 = vpop.eup %3426 }
 0x508   : > { %3438 = vrcp.f32 %v1490_v16  ;;  %v1502_v21 = vmul.f32 %v3427_v18, %v4086_v44  ;;  %v3384_v44 = vld [vmem:[#allocation5 + $0x28] sm:$0xff]  }
 0x50a   : > { %v1493_v19 = vpop.xlane.xlu1 %1492 }
 0x50b   : > { %3440 = vrcp.f32 %v1493_v19  ;;  %v3429_v20 = vpop.eup %3428 }
 0x50c   : > { %v1503_v22 = vmul.f32 %v3429_v20, %v3415_v48  ;;  %v3431_v23 = vpop.eup %3430 }
 0x50d   : > { %v1504_v26 = vmul.f32 %v3431_v23, %v4090_v47  ;;  %v3390_v47 = vld [vmem:[#allocation5 + $0x10] sm:$0xff]  }
 0x50e   : > { %v1510_v24 = vpack.c.bf16 %v1503_v22, %v1502_v21 }
 0x50f   : > { %v3433_v25 = vpop.eup %3432 }
 0x510   : > { %v1505_v27 = vmul.f32 %v3433_v25, %v3417_v51  ;;  %3115 = vmatprep.mubr.msk.bf16.mxu1 %vm872_vm1, %v1510_v24  ;;  %v3435_v28 = vpop.eup %3434 }
 0x511   : > { %v1506_v31 = vmul.f32 %v3435_v28, %v3419_v52 }
 0x512   : > { %v1511_v29 = vpack.c.bf16 %v1505_v27, %v1504_v26  ;;  %v3397_v26 = vld [vmem:[#allocation2] sm:$0xff]  }
 0x514   : > { %v3437_v30 = vpop.eup %3436  ;;  %3116 = vmatmul.mubr.msk.bf16.vlgmr.msra.gmra.mxu1 %vm872_vm1, %v1511_v29 }
 0x515   : > { %v1507_v32 = vmul.f32 %v3437_v30, %v3423_v56  ;;  %v3439_v33 = vpop.eup %3438  ;;  %3148 = vmatpush3.bf16.msra.mxu1 %v3380_v41 }
 0x516   : > { %v1508_v36 = vmul.f32 %v3439_v33, %v4097_v55  ;;  %3149 = vmatprep.subr.bf16.mxu1 %v3382_v43  ;;  %v3383_v55 = vld [vmem:[#allocation7 + $0x30] sm:$0xff]   ;;  %v3400_v33 = vld [vmem:[%s3964_s18 + $0x10] sm:$0xff]  }
 0x517   : > { %v1512_v34 = vpack.c.bf16 %v1507_v32, %v1506_v31  ;;  %v3398_v31 = vld [vmem:[%s3964_s18] sm:$0xff]  }
 0x518   : > { %v3441_v35 = vpop.eup %3440 }
 0x519   : > { %3119 = vmatprep.mubr.msk.bf16.mxu1 %vm872_vm1, %v1512_v34  ;;  %v1509_v37 = vmul.f32 %v3441_v35, %v3425_v63  ;;  %3150 = vmatpush3.bf16.msra.mxu1 %v3382_v43  ;;  %v3405_v34 = vld [vmem:[#allocation8 + $0x20] sm:$0xff]   ;;  %v3406_v35 = vld [vmem:[#allocation8 + $0x18] sm:$0xff]  }
 0x51a   : > { %3151 = vmatprep.subr.bf16.mxu1 %v3384_v44 }
 0x51b   : > { %v1513_v38 = vpack.c.bf16 %v1509_v37, %v1508_v36  ;;  %v3407_v36 = vld [vmem:[#allocation8 + $0x10] sm:$0xff]   ;;  %v3408_v37 = vld [vmem:[#allocation8 + $0x8] sm:$0xff]  }
 0x51d   : > { %3120 = vmatmul.mubr.msk.bf16.gmra.mxu1 %vm872_vm1, %v1513_v38  ;;  %v3409_v38 = vld [vmem:[#allocation8] sm:$0xff]  }
 0x51e   : > { %3152 = vmatpush3.bf16.msra.mxu1 %v3384_v44 }
 0x51f   : > { %3153 = vmatprep.subr.bf16.mxu1 %v3386_v45 }
 0x522   : > { %3154 = vmatpush3.bf16.msra.mxu1 %v3386_v45 }
 0x523   : > { %3155 = vmatprep.subr.bf16.mxu1 %v3388_v46 }
 0x526   : > { %3156 = vmatpush3.bf16.msra.mxu1 %v3388_v46 }
 0x527   : > { %3157 = vmatprep.subr.bf16.mxu1 %v3390_v47 }
 0x52a   : > { %3158 = vmatpush3.bf16.msra.mxu1 %v3390_v47 }
 0x52b   : > { %3159 = vmatprep.subr.bf16.mxu1 %v3392_v6 }
 0x52e   : > { %3160 = vmatpush3.bf16.msra.mxu1 %v3392_v6 }
 0x52f   : > { %3161 = vmatprep.subr.bf16.mxu1 %v3394_v11 }
 0x532   : > { %3162 = vmatpush3.bf16.msra.mxu1 %v3394_v11 }
 0x533   : > { %3195 = vmatprep.subr.bf16.mxu1 %v3396_v13 }
 0x5d4   : > { %v3117_v48 = vpop.f32.mrf.mxu1 }
 0x5d6   : > { %v1564_v49 = vpop.f32.mrf.mxu1 }
 0x5d8   : > { %v3118_v50 = vpop.f32.mrf.mxu1 }
 0x5d9   : > { %v1596_v53 = vpack.c.bf16 %v3118_v50, %v3117_v48 }
 0x5da   : > { %v1567_v51 = vpop.f32.mrf.mxu1 }
 0x5db   : > { %v1595_v52 = vpack.c.bf16 %v1567_v51, %v1564_v49 }
 0x5dd   : > { %v3121_v54 = vpop.f32.mrf.mxu1  ;;  %3139 = vmatprep.mubr.bf16.mxu0 %v1595_v52 }
 0x5de   : > { %3140 = vmatmul.mubr.bf16.vlgmr.msra.gmra.mxu0 %v1596_v53 }
 0x5df   : > { %v1580_v56 = vpop.f32.mrf.mxu1  ;;  %3172 = vmatpush3.bf16.msra.mxu0 %v3381_v42 }
 0x5e0   : > { %3173 = vmatprep.subr.bf16.mxu0 %v3383_v55 }
 0x5e1   : > { %v3122_v58 = vpop.f32.mrf.mxu1 }
 0x5e2   : > { %v1598_v1 = vpack.c.bf16 %v3122_v58, %v3121_v54 }
 0x5e3   : > { %v1583_v63 = vpop.f32.mrf.mxu1  ;;  %3174 = vmatpush3.bf16.msra.mxu0 %v3383_v55 }
 0x5e4   : > { %v1597_v0 = vpack.c.bf16 %v1583_v63, %v1580_v56  ;;  %3175 = vmatprep.subr.bf16.mxu0 %v3385_v62 }
 0x5e6   : > { %3143 = vmatprep.mubr.bf16.mxu0 %v1597_v0 }
 0x5e7   : > { %3144 = vmatmul.mubr.bf16.gmra.mxu0 %v1598_v1  ;;  %v2763_v1 = vld [vmem:[%s4353_s10] ss:$0 sm:$0xff] }
 0x5e8   : > { %3176 = vmatpush3.bf16.msra.mxu0 %v3385_v62 }
 0x5e9   : > { %3177 = vmatprep.subr.bf16.mxu0 %v3387_v2 }
 0x5ec   : > { %3178 = vmatpush3.bf16.msra.mxu0 %v3387_v2 }
 0x5ed   : > { %3179 = vmatprep.subr.bf16.mxu0 %v3389_v3 }
 0x5f0   : > { %3180 = vmatpush3.bf16.msra.mxu0 %v3389_v3 }
 0x5f1   : > { %3181 = vmatprep.subr.bf16.mxu0 %v3391_v5 }
 0x5f4   : > { %3182 = vmatpush3.bf16.msra.mxu0 %v3391_v5 }
 0x5f5   : > { %3183 = vmatprep.subr.bf16.mxu0 %v3393_v10 }
 0x5f8   : > { %3184 = vmatpush3.bf16.msra.mxu0 %v3393_v10 }
 0x5f9   : > { %3185 = vmatprep.subr.bf16.mxu0 %v3395_v12 }
 0x5fc   : > { %3186 = vmatpush3.bf16.msra.mxu0 %v3395_v12 }
 0x69e   : > { %v3141_v14 = vpop.f32.mrf.mxu0 }
 0x69f   : > { %v1730_v21 = vadd.f32 %v3141_v14, %v4039_v61 }
 0x6a0   : > { %v1697_v15 = vpop.f32.mrf.mxu0 }
 0x6a1   : > { %v1728_v19 = vadd.f32 %v1697_v15, %v4035_v59  ;;  %v3402_v59 = vld [vmem:[#allocation8 + $0x38] sm:$0xff]  }
 0x6a2   : > { %v3142_v16 = vpop.f32.mrf.mxu0 }
 0x6a3   : > { %v1731_v17 = vadd.f32 %v3142_v16, %v4033_v57 }
 0x6a4   : > { %v1700_v18 = vpop.f32.mrf.mxu0 }
 0x6a5   : > { %v1729_v20 = vadd.f32 %v1700_v18, %v4037_v60  ;;  %v1737_v24 = vpack.c.bf16 %v1731_v17, %v1730_v21 }
 0x6a7   : > { %v3145_v22 = vpop.f32.mrf.mxu0  ;;  %v1736_v23 = vpack.c.bf16 %v1729_v20, %v1728_v19 }
 0x6a8   : > { %v1734_v29 = vadd.f32 %v3145_v22, %v4057_v9  ;;  %v3404_v9 = vld [vmem:[#allocation8 + $0x28] sm:$0xff]  }
 0x6a9   : > { %v1713_v25 = vpop.f32.mrf.mxu0  ;;  %3163 = vmatprep.mubr.bf16.mxu1 %v1736_v23  ;;  %3187 = vmatprep.mubr.bf16.mxu0 %v1736_v23 }
 0x6aa   : > { %3164 = vmatmul.mubr.bf16.vlgmr.msra.gmra.mxu1 %v1737_v24  ;;  %3188 = vmatmul.mubr.bf16.vlgmr.msra.gmra.mxu0 %v1737_v24  ;;  %v1732_v60 = vadd.f32 %v1713_v25, %v4053_v7  ;;  %v3401_v7 = vld [vmem:[%s3964_s18 + $0x18] sm:$0xff]  }
 0x6ab   : > { %v3146_v27 = vpop.f32.mrf.mxu0  ;;  %3196 = vmatpush3.bf16.msra.mxu1 %v3396_v13 }
 0x6ac   : > { %v1735_v57 = vadd.f32 %v3146_v27, %v4048_v4  ;;  %3197 = vmatprep.subr.bf16.mxu1 %v3397_v26  ;;  %v3399_v4 = vld [vmem:[%s3964_s18 + $0x8] sm:$0xff]   ;;  %s4151_s18 = sand.u32 1, %s3696_s25  }
 0x6ad   : > { %v1716_v28 = vpop.f32.mrf.mxu0  ;;  %s2664_s30 = sshll.u32 %s4151_s18, 5  ;;  %s4369_s21 = sshll.u32 %s4151_s18, 6 }
 0x6ae   : > { %v1733_v61 = vadd.f32 %v1716_v28, %v4055_v8  ;;  %v1739_v32 = vpack.c.bf16 %v1735_v57, %v1734_v29  ;;  %v3403_v8 = vld [vmem:[#allocation8 + $0x30] sm:$0xff]   ;;  %s4154_s26 = scalar_lea.vmem [#allocation10], %s2664_s30  ;;  %s4157_s0 = scalar_lea.vmem [#allocation11], %s2664_s30 }
 0x6af   : > { %3198 = vmatpush3.bf16.msra.mxu1 %v3397_v26  ;;  %s4172_s24 = scalar_lea.vmem [#allocation13], %s4369_s21  ;;  %s2384_s27 = sshll.u32 %s4154_s26, 4  ;;  %s4185_s27 = int_to_ptr.vmem [resolvable:$true] %s2384_s27 }
 0x6b0   : > { %v1738_v30 = vpack.c.bf16 %v1733_v61, %v1732_v60  ;;  %3207 = vmatprep.subr.bf16.mxu1 %v3402_v59  ;;  %s2416_s29 = sshll.u32 %s4172_s24, 4  ;;  %s2400_s23 = sshll.u32 %s4157_s0, 4  ;;  %s4187_s29 = int_to_ptr.vmem [resolvable:$true] %s2416_s29  ;;  %s4189_s23 = int_to_ptr.vmem [resolvable:$true] %s2400_s23 }
 0x6b1   : > { %s4370_s30 = sshll.u32 %s3831_s28, 9 }
 0x6b2   : > { %3167 = vmatprep.mubr.bf16.mxu1 %v1738_v30  ;;  %3191 = vmatprep.mubr.bf16.mxu0 %v1738_v30  ;;  %s4198_s21 = scalar_lea.hbm %s4358_s15, %s4370_s30 }
 0x6b3   : > { %3168 = vmatmul.mubr.bf16.gmra.mxu1 %v1739_v32  ;;  %3192 = vmatmul.mubr.bf16.gmra.mxu0 %v1739_v32 }
 0x6b4   : > { %3199 = vmatprep.mubr.msk.bf16.mxu1 %vm731_vm0, %v3398_v31 }
 0x6bb   : > { %3200 = vmatmul.mubr.msk.bf16.vlgmr.msra.gmra.mxu1 %vm731_vm0, %v3399_v4 }
 0x6bc   : > { %3203 = vmatprep.mubr.msk.bf16.mxu1 %vm731_vm0, %v3400_v33  ;;  %3208 = vmatpush3.bf16.msra.mxu1 %v3402_v59 }
 0x6bd   : > { %3209 = vmatprep.subr.bf16.mxu1 %v3403_v8 }
 0x6c0   : > { %3210 = vmatpush3.bf16.msra.mxu1 %v3403_v8 }
 0x6c1   : > { %3211 = vmatprep.subr.bf16.mxu1 %v3404_v9 }
 0x6c3   : > { %3204 = vmatmul.mubr.msk.bf16.gmra.mxu1 %vm731_vm0, %v3401_v7 }
 0x6c4   : > { %3212 = vmatpush3.bf16.msra.mxu1 %v3404_v9 }
 0x6c5   : > { %3213 = vmatprep.subr.bf16.mxu1 %v3405_v34 }
 0x6c8   : > { %3214 = vmatpush3.bf16.msra.mxu1 %v3405_v34 }
 0x6c9   : > { %3215 = vmatprep.subr.bf16.mxu1 %v3406_v35 }
 0x6cc   : > { %3216 = vmatpush3.bf16.msra.mxu1 %v3406_v35 }
 0x6cd   : > { %3217 = vmatprep.subr.bf16.mxu1 %v3407_v36 }
 0x6d0   : > { %3218 = vmatpush3.bf16.msra.mxu1 %v3407_v36 }
 0x6d1   : > { %3219 = vmatprep.subr.bf16.mxu1 %v3408_v37 }
 0x6d4   : > { %3220 = vmatpush3.bf16.msra.mxu1 %v3408_v37 }
 0x6d5   : > { %3221 = vmatprep.subr.bf16.mxu1 %v3409_v38 }
 0x6d8   : > { %3222 = vmatpush3.bf16.msra.mxu1 %v3409_v38 }
 0x76a   : > { %v3165_v39 = vpop.f32.mrf.mxu1  ;;  %v3189_v40 = vpop.f32.mrf.mxu0 }
 0x76c   : > { %v1838_v41 = vpop.f32.mrf.mxu1  ;;  %v2007_v42 = vpop.f32.mrf.mxu0 }
 0x76e   : > { %v3166_v43 = vpop.f32.mrf.mxu1  ;;  %v3190_v44 = vpop.f32.mrf.mxu0 }
 0x76f   : > { %v2827_v45 = vpack.c.bf16 %v3166_v43, %v3165_v39  ;;  %v2847_v46 = vpack.c.bf16 %v3190_v44, %v3189_v40 }
 0x770   : > { %v1841_v47 = vpop.f32.mrf.mxu1  ;;  %v2010_v48 = vpop.f32.mrf.mxu0 }
 0x771   : > { %2859 = vst [vmem:[%s4154_s26 + $0x8] sm:$0xff] %v2827_v45   ;;  %2862 = vst [vmem:[%s4157_s0 + $0x8] sm:$0xff] %v2847_v46   ;;  %v2822_v49 = vpack.c.bf16 %v1841_v47, %v1838_v41  ;;  %v2842_v50 = vpack.c.bf16 %v2010_v48, %v2007_v42 }
 0x773   : > { %v3169_v51 = vpop.f32.mrf.mxu1  ;;  %v3193_v52 = vpop.f32.mrf.mxu0  ;;  %2823 = vst [vmem:[%s4154_s26] sm:$0xff] %v2822_v49   ;;  %2843 = vst [vmem:[%s4157_s0] sm:$0xff] %v2842_v50  }
 0x775   : > { %v1854_v53 = vpop.f32.mrf.mxu1  ;;  %v2023_v54 = vpop.f32.mrf.mxu0 }
 0x777   : > { %v3170_v55 = vpop.f32.mrf.mxu1  ;;  %v3194_v56 = vpop.f32.mrf.mxu0 }
 0x778   : > { %v2837_v58 = vpack.c.bf16 %v3170_v55, %v3169_v51  ;;  %v2857_v62 = vpack.c.bf16 %v3194_v56, %v3193_v52 }
 0x779   : > { %v1857_v63 = vpop.f32.mrf.mxu1  ;;  %v2026_v0 = vpop.f32.mrf.mxu0 }
 0x77a   : > { %2861 = vst [vmem:[%s4154_s26 + $0x18] sm:$0xff] %v2837_v58   ;;  %2864 = vst [vmem:[%s4157_s0 + $0x18] sm:$0xff] %v2857_v62   ;;  %v2832_v2 = vpack.c.bf16 %v1857_v63, %v1854_v53  ;;  %v2852_v3 = vpack.c.bf16 %v2026_v0, %v2023_v54 }
 0x77b   : > { %v3201_v5 = vpop.f32.mrf.mxu1 }
 0x77c   : > { %2860 = vst [vmem:[%s4154_s26 + $0x10] sm:$0xff] %v2832_v2   ;;  %2863 = vst [vmem:[%s4157_s0 + $0x10] sm:$0xff] %v2852_v3   ;;  %v2184_v6 = vadd.f32 %v3201_v5, %v2763_v1  ;;  %s4200_s26 = scalar_lea.sflag [#allocation12], %s2360_s19  ;;  %s3546_s0 = scalar_lea.vmem %s4189_s23, 512 }
 0x77d   : > { %v2175_v10 = vpop.f32.mrf.mxu1  ;;  %p3547_p9 = scmp.ne.s32.totalorder %s4189_s23, %s3546_s0 }
 0x77e   : > { %2208 = vst [vmem:[%s4172_s24 + $0x10] sm:$0xff] %v2184_v6  ;;  %v2176_v11 = vadd.f32 %v2763_v1, %v2175_v10 }
 0x77f   : > { %v3202_v12 = vpop.f32.mrf.mxu1  ;;  %p3548_p12 = pnand %p3547_p9, %p3850_p5 }
 0x780   : > { %2206 = vst [vmem:[%s4172_s24] sm:$0xff] %v2176_v11  ;;  %v2187_v13 = vadd.f32 %v3202_v12, %v2763_v1 }
 0x781   : > { %v2178_v14 = vpop.f32.mrf.mxu1  ;;  %p3549_p13 = pneg %p3548_p12 }
 0x782   : > { %2209 = vst [vmem:[%s4172_s24 + $0x18] sm:$0xff] %v2187_v13  ;;  %v2179_v15 = vadd.f32 %v2763_v1, %v2178_v14  ;;  %v2215_v19 = vpack.c.bf16 %v2187_v13, %v2184_v6 }
 0x783   : > { %v3205_v16 = vpop.f32.mrf.mxu1 }
 0x784   : > { %2207 = vst [vmem:[%s4172_s24 + $0x8] sm:$0xff] %v2179_v15  ;;  %v2214_v17 = vpack.c.bf16 %v2179_v15, %v2176_v11  ;;  %v2200_v18 = vadd.f32 %v3205_v16, %v2763_v1 }
 0x785   : > { %v2191_v20 = vpop.f32.mrf.mxu1 }
 0x786   : > { %2212 = vst [vmem:[%s4172_s24 + $0x30] sm:$0xff] %v2200_v18  ;;  %v2192_v21 = vadd.f32 %v2763_v1, %v2191_v20  ;;  %3223 = vmatprep.mubr.bf16.mxu1 %v2214_v17 }
 0x787   : > { %v3206_v22 = vpop.f32.mrf.mxu1  ;;  %3224 = vmatmul.mubr.bf16.vlgmr.msra.gmra.mxu1 %v2215_v19 }
 0x788   : > { %2210 = vst [vmem:[%s4172_s24 + $0x20] sm:$0xff] %v2192_v21  ;;  %v2203_v23 = vadd.f32 %v3206_v22, %v2763_v1 }
 0x789   : > { %v2194_v24 = vpop.f32.mrf.mxu1 }
 0x78a   : > { %2213 = vst [vmem:[%s4172_s24 + $0x38] sm:$0xff] %v2203_v23  ;;  %v2195_v25 = vadd.f32 %v2763_v1, %v2194_v24  ;;  %v2217_v27 = vpack.c.bf16 %v2203_v23, %v2200_v18 }
 0x78c   : > { %2211 = vst [vmem:[%s4172_s24 + $0x28] sm:$0xff] %v2195_v25  ;;  %v2216_v26 = vpack.c.bf16 %v2195_v25, %v2192_v21  ;;  %s3712_s24 = smov [#allocation11]  }
 0x78d   : > { %s3550_s2 = sshll.u32 %s3712_s24, 4  ;;  %s3551_s2 = int_to_ptr.vmem [resolvable:$false] %s3550_s2 }
 0x78e   : > { %3227 = vmatprep.mubr.bf16.mxu1 %v2216_v26  ;;  %s3552_s3 = scalar_lea.vmem %s3551_s2, 1024  ;;  %p3553_p4 = scmp.lt.s32.totalorder %s4189_s23, %s3551_s2 }
 0x78f   : > { %3228 = vmatmul.mubr.bf16.gmra.mxu1 %v2217_v27  ;;  %p3554_p7 = scmp.lt.s32.totalorder %s3552_s3, %s3546_s0 }
 0x791   : > { %p3555_p8 = por %p3554_p7, %p3553_p4 }
 0x793   : > { %p3556_p11 = pnand %p3555_p8, %p3549_p13 }
 0x795   : > { %3559 = shalt.err (!%p3556_p11)
}
 0x796   : > { %s3560_s19 = scalar_lea.hbm %s4198_s21, 512  ;;  %s3564_s24 = scalar_lea.hbm %s4358_s15, 1024 }
 0x797   : > { %p3561_p0 = scmp.ne.s32.totalorder %s4198_s21, %s3560_s19  ;;  %p3565_p3 = scmp.lt.s32.totalorder %s4198_s21, %s4358_s15 }
 0x798   : > { %p3566_p10 = scmp.lt.s32.totalorder %s3564_s24, %s3560_s19 }
 0x799   : > { %p3562_p2 = pnand %p3561_p0, %p3850_p5 }
 0x79a   : > { %p3567_p9 = por %p3566_p10, %p3565_p3 }
 0x79b   : > { %p3563_p1 = pneg %p3562_p2 }
 0x79d   : > { %p3568_p12 = pnand %p3567_p9, %p3563_p1 }
 0x79f   : > { %3571 = shalt.err (!%p3568_p12)
}
 0x7a0   : > { %s3713_s2 = smov 64   ;;  %s3714_s3 = smov 4  }
 0x7a1   : > { %3252 = dma.vmem_to_hbm [thread:$0]  (%p3850_p5), %s4189_s23, 512, %s4198_s21, %s4200_s26, %s3713_s2, %s3713_s2, %s3714_s3  }
 0x7a2   : > { %s4397_s4 = sshll.u32 %s3831_s28, 9  ;;  %s2817_s22 = sshll.u32 %s3831_s28, 10 }
 0x7a3   : > { %s4231_s19 = scalar_lea.hbm %s4357_s14, %s4397_s4  ;;  %s2356_s20 = scalar_lea.sflag [#allocation4], %s4151_s18 }
 0x7a4   : > { %s3572_s24 = scalar_lea.vmem %s4185_s27, 512  ;;  %s3715_s5 = smov [#allocation10]  }
 0x7a5   : > { %p3573_p13 = scmp.ne.s32.totalorder %s4185_s27, %s3572_s24  ;;  %s3576_s6 = sshll.u32 %s3715_s5, 4  ;;  %s3577_s6 = int_to_ptr.vmem [resolvable:$false] %s3576_s6 }
 0x7a6   : > { %s3578_s7 = scalar_lea.vmem %s3577_s6, 1024  ;;  %p3579_p8 = scmp.lt.s32.totalorder %s4185_s27, %s3577_s6 }
 0x7a7   : > { %p3574_p4 = pnand %p3573_p13, %p3850_p5  ;;  %p3580_p11 = scmp.lt.s32.totalorder %s3578_s7, %s3572_s24 }
 0x7a9   : > { %p3575_p7 = pneg %p3574_p4  ;;  %p3581_p0 = por %p3580_p11, %p3579_p8 }
 0x7ab   : > { %p3582_p2 = pnand %p3581_p0, %p3575_p7 }
 0x7ad   : > { %3585 = shalt.err (!%p3582_p2)
}
 0x7ae   : > { %s3586_s21 = scalar_lea.hbm %s4231_s19, 512  ;;  %s3590_s5 = scalar_lea.hbm %s4357_s14, 1024 }
 0x7af   : > { %p3587_p1 = scmp.ne.s32.totalorder %s4231_s19, %s3586_s21  ;;  %p3591_p9 = scmp.lt.s32.totalorder %s4231_s19, %s4357_s14 }
 0x7b0   : > { %p3592_p12 = scmp.lt.s32.totalorder %s3590_s5, %s3586_s21 }
 0x7b1   : > { %p3588_p3 = pnand %p3587_p1, %p3850_p5 }
 0x7b2   : > { %p3593_p13 = por %p3592_p12, %p3591_p9 }
 0x7b3   : > { %p3589_p10 = pneg %p3588_p3 }
 0x7b5   : > { %p3594_p4 = pnand %p3593_p13, %p3589_p10 }
 0x7b7   : > { %3597 = shalt.err (!%p3594_p4)
}
 0x7b8   : > { %3251 = dma.vmem_to_hbm [thread:$0]  (%p3850_p5), %s4185_s27, 512, %s4231_s19, %s2356_s20, %s3713_s2, %s3713_s2, %s3714_s3  }
 0x7b9   : > { %s4263_s24 = scalar_lea.hbm %s4359_s16, %s2817_s22  ;;  %s3598_s21 = scalar_lea.vmem %s4187_s29, 1024 }
 0x7ba   : > { %p3599_p7 = scmp.ne.s32.totalorder %s4187_s29, %s3598_s21  ;;  %s3716_s23 = smov [#allocation13]  }
 0x7bb   : > { %s3602_s4 = sshll.u32 %s3716_s23, 4  ;;  %s3603_s4 = int_to_ptr.vmem [resolvable:$false] %s3602_s4 }
 0x7bc   : > { %p3600_p8 = pnand %p3599_p7, %p3850_p5  ;;  %s3604_s5 = scalar_lea.vmem %s3603_s4, 2048 }
 0x7bd   : > { %p3605_p0 = scmp.lt.s32.totalorder %s4187_s29, %s3603_s4  ;;  %p3606_p2 = scmp.lt.s32.totalorder %s3604_s5, %s3598_s21 }
 0x7be   : > { %p3601_p11 = pneg %p3600_p8 }
 0x7bf   : > { %p3607_p1 = por %p3606_p2, %p3605_p0 }
 0x7c1   : > { %p3608_p3 = pnand %p3607_p1, %p3601_p11 }
 0x7c3   : > { %3611 = shalt.err (!%p3608_p3)
}
 0x7c4   : > { %s3612_s27 = scalar_lea.hbm %s4263_s24, 1024  ;;  %s3616_s19 = scalar_lea.hbm %s4359_s16, 2048 }
 0x7c5   : > { %p3613_p10 = scmp.ne.s32.totalorder %s4263_s24, %s3612_s27  ;;  %p3617_p13 = scmp.lt.s32.totalorder %s4263_s24, %s4359_s16 }
 0x7c6   : > { %p3618_p4 = scmp.lt.s32.totalorder %s3616_s19, %s3612_s27 }
 0x7c7   : > { %p3614_p9 = pnand %p3613_p10, %p3850_p5 }
 0x7c8   : > { %p3619_p7 = por %p3618_p4, %p3617_p13 }
 0x7c9   : > { %p3615_p12 = pneg %p3614_p9 }
 0x7cb   : > { %p3620_p8 = pnand %p3619_p7, %p3615_p12 }
 0x7cd   : > { %3623 = shalt.err (!%p3620_p8)
}
 0x7ce   : > { %s3717_s0 = smov 128   ;;  %s3718_s6 = smov 8  }
 0x7cf   : > { %3253 = dma.vmem_to_hbm [thread:$0]  (%p3850_p5), %s4187_s29, 1024, %s4263_s24, %s4200_s26, %s3717_s0, %s3717_s0, %s3718_s6  }
 0x7d0   : > { %s4398_s7 = sshll.u32 %s4151_s18, 6  ;;  %s4298_s24 = scalar_lea.hbm %s4360_s17, %s2817_s22 }
 0x7d1   : > { %s658_s21 = scalar_lea.vmem [#allocation14], %s4398_s7  ;;  %s2371_s4 = scalar_lea.sflag [#allocation15], %s4151_s18 }
 0x7d2   : > { %s2432_s23 = sshll.u32 %s658_s21, 4  ;;  %s3719_s27 = smov [#allocation14]   ;;  %s4291_s23 = int_to_ptr.vmem [resolvable:$true] %s2432_s23 }
 0x7d3   : > { %s3624_s5 = scalar_lea.vmem %s4291_s23, 1024  ;;  %s3628_s2 = sshll.u32 %s3719_s27, 4  ;;  %s3629_s2 = int_to_ptr.vmem [resolvable:$false] %s3628_s2 }
 0x7d4   : > { %p3625_p11 = scmp.ne.s32.totalorder %s4291_s23, %s3624_s5  ;;  %s3630_s3 = scalar_lea.vmem %s3629_s2, 2048 }
 0x7d5   : > { %p3631_p1 = scmp.lt.s32.totalorder %s4291_s23, %s3629_s2  ;;  %p3632_p3 = scmp.lt.s32.totalorder %s3630_s3, %s3624_s5 }
 0x7d6   : > { %p3626_p0 = pnand %p3625_p11, %p3850_p5 }
 0x7d7   : > { %p3633_p10 = por %p3632_p3, %p3631_p1 }
 0x7d8   : > { %p3627_p2 = pneg %p3626_p0 }
 0x7da   : > { %p3634_p9 = pnand %p3633_p10, %p3627_p2 }
 0x847   : > { %v3225_v57 = vpop.f32.mrf.mxu1 }
 0x848   : > { %2349 = vst [vmem:[%s658_s21 + $0x10] sm:$0xff] %v3225_v57 }
 0x849   : > { %v2316_v28 = vpop.f32.mrf.mxu1 }
 0x84a   : > { %2347 = vst [vmem:[%s658_s21] sm:$0xff] %v2316_v28 }
 0x84b   : > { %v3226_v59 = vpop.f32.mrf.mxu1 }
 0x84c   : > { %2350 = vst [vmem:[%s658_s21 + $0x18] sm:$0xff] %v3226_v59 }
 0x84d   : > { %v2319_v60 = vpop.f32.mrf.mxu1 }
 0x84e   : > { %2348 = vst [vmem:[%s658_s21 + $0x8] sm:$0xff] %v2319_v60 }
 0x84f   : > { %v3229_v61 = vpop.f32.mrf.mxu1 }
 0x850   : > { %2353 = vst [vmem:[%s658_s21 + $0x30] sm:$0xff] %v3229_v61 }
 0x851   : > { %v2332_v29 = vpop.f32.mrf.mxu1 }
 0x852   : > { %2351 = vst [vmem:[%s658_s21 + $0x20] sm:$0xff] %v2332_v29 }
 0x853   : > { %v3230_v30 = vpop.f32.mrf.mxu1 }
 0x854   : > { %2354 = vst [vmem:[%s658_s21 + $0x38] sm:$0xff] %v3230_v30 }
 0x855   : > { %v2335_v31 = vpop.f32.mrf.mxu1 }
 0x856   : > { %2352 = vst [vmem:[%s658_s21 + $0x28] sm:$0xff] %v2335_v31 }
 0x857   : > { %3637 = shalt.err (!%p3634_p9)
}
 0x858   : > { %s3638_s28 = scalar_lea.hbm %s4298_s24, 1024  ;;  %s3642_s19 = scalar_lea.hbm %s4360_s17, 2048 }
 0x859   : > { %p3639_p12 = scmp.ne.s32.totalorder %s4298_s24, %s3638_s28  ;;  %p3643_p7 = scmp.lt.s32.totalorder %s4298_s24, %s4360_s17 }
 0x85a   : > { %p3644_p8 = scmp.lt.s32.totalorder %s3642_s19, %s3638_s28 }
 0x85b   : > { %p3640_p13 = pnand %p3639_p12, %p3850_p5 }
 0x85c   : > { %p3645_p11 = por %p3644_p8, %p3643_p7 }
 0x85d   : > { %p3641_p4 = pneg %p3640_p13 }
 0x85f   : > { %p3646_p0 = pnand %p3645_p11, %p3641_p4 }
 0x861   : > { %3649 = shalt.err (!%p3646_p0)
}
 0x862   : > { %3254 = dma.vmem_to_hbm [thread:$0]  (%p3850_p5), %s4291_s23, 1024, %s4298_s24, %s2371_s4, %s3717_s0, %s3717_s0, %s3718_s6  }
 0x863 PF: > { %s4399_s7 = sld [smem:[#allocation24_spill]] }
 0x864   : > { %s4400_s21 = sld [smem:[#allocation22_spill]] }
 0x869   : > { %p3293_p2 = scmp.ge.s32.totalorder %s4399_s7, 2 }
 0x86a   : > { %s2447_s26 = sand.u32 1, %s4400_s21  }
 0x86b   : > { %p3273_p1 = pnand %p3293_p2, %p3854_p6  ;;  %s2448_s5 = scalar_lea.sflag [#allocation4], %s2447_s26 }
 0x86d   : > { %p3274_p3 = pneg %p3273_p1 }
 0x86f   : > { %3679 = dma.done.wait (%p3274_p3), %s2448_s5, 512  }
 0x870   : > { %3681 = vsyncadd (%p3274_p3), %s2448_s5, 4294966784  ;;  %s4402_s1 = sadd.s32 4294967294, %s4399_s7  }
 0x871   : > { %s2456_s27 = sand.u32 1, %s4402_s1  }
 0x872   : > { %s2457_s2 = scalar_lea.sflag [#allocation12], %s2456_s27 }
 0x873   : > { %3683 = dma.done.wait (%p3274_p3), %s2457_s2, 1536  }
 0x874   : > { %3685 = vsyncadd (%p3274_p3), %s2457_s2, 4294965760  ;;  %s2475_s3 = scalar_lea.sflag [#allocation15], %s2447_s26 }
 0x875   : > { %3687 = dma.done.wait (%p3274_p3), %s2475_s3, 1024  }
 0x876   : > { %3689 = vsyncadd (%p3274_p3), %s2475_s3, 4294966272  ;;  %s4403_s27 = sld [smem:[#allocation25_spill]]  ;;  %s4406_s24 = smov %s3696_s25 }
 0x877   : > { %s4404_s0 = sld [smem:[#allocation23_spill]] }
 0x878   : > { %s4405_s26 = sld [smem:[#allocation26_spill]] }
 0x87c   : > { %p37_p5 = scmp.ge.s32.totalorder %s4403_s27, 4  }
 0x87d   : > { %s4407_s25 = smov %s4404_s0 }
 0x87e   :  { %39 = sbr.rel (!%p37_p5) target bundleno = 19 (0x13), region = 183 }
 0x883   :  { %2480 = vsyncpa [#allocation3], 1 }
 0x884   :  { %2482 = vsyncpa [#allocation3 + $0x1], 1 }
 0x885   :  { %2483 = vsyncpa [#allocation6], 1 }
 0x886   :  { %2484 = vsyncpa [#allocation9], 1 }
 0x887   :  { %2485 = vsyncpa [#allocation4], 1 }
 0x888   :  { %2487 = vsyncpa [#allocation4 + $0x1], 1 }
 0x889   :  { %2488 = vsyncpa [#allocation12], 1 }
 0x88a   :  { %2490 = vsyncpa [#allocation12 + $0x1], 1 }
 0x88b   :  { %2491 = vsyncpa [#allocation15], 1 }
 0x88c   :  { %2493 = vsyncpa [#allocation15 + $0x1], 1 }

</bundles_post_ra>
